<compile_context>
chip_gen: v7x
topology: tpu7x:2x2x1
jax: 0.10.0
libtpu: 0.0.40
codegen_flags: <defaults>
</compile_context>

<pallas_src>
import functools

import jax
import jax.numpy as jnp
from jax.experimental import pallas as pl
from jax.experimental.pallas import tpu as pltpu


def _cbam_kernel(x_ref, w1t_ref, w2t_ref, wsp_ref, masks_ref, o_ref,
                 avgf_ref, maxf_ref, *, C, H, W, HID, K, Bt, upcast_apply):
    HW = H * W
    pad = (K - 1) // 2
    DS = pad * W + pad            # data start inside the flat padded scratch
    # scratch width L = HW + 2*DS (allocated by the wrapper)

    x = x_ref[...]                                      # (Bt, C, HW), native dtype
    xw = x.astype(jnp.float32) if upcast_apply else x   # compute dtype for applies

    # ---------------- channel attention ----------------
    avg_bc = jnp.mean(x, axis=-1, dtype=jnp.float32)    # (Bt, C) global avg pool
    max_bc = jnp.max(x, axis=-1).astype(jnp.float32)    # (Bt, C) global max pool
    rows = jnp.concatenate([avg_bc, max_bc], axis=0)    # (2*Bt, C)

    # Shared bias-free 1x1-conv MLP (C -> HID -> C) as two small matmuls.
    h = jnp.dot(rows, w1t_ref[...], preferred_element_type=jnp.float32)   # (2*Bt, HID)
    h = jnp.maximum(h, 0.0)
    y = jnp.dot(h, w2t_ref[...], preferred_element_type=jnp.float32)      # (2*Bt, C)
    ca = jax.nn.sigmoid(y[:Bt] + y[Bt:])                # (Bt, C) f32

    ca_b = ca[:, :, None] if upcast_apply else ca[:, :, None].astype(xw.dtype)
    x1 = xw * ca_b                                      # (Bt, C, HW)

    # ---------------- spatial attention ----------------
    s_avg = jnp.mean(x1, axis=1, dtype=jnp.float32)     # (Bt, HW) channel mean
    s_max = jnp.max(x1, axis=1).astype(jnp.float32)     # (Bt, HW) channel max

    # One interior store per map into the flat, row-zero-bordered scratch.
    # The zero borders cover kh row under/overflow; kw column wrap-around is
    # masked per-kw below.  No per-row scatter, no flat<->2D relayout.
    zero_border = jnp.zeros((Bt, DS), jnp.float32)
    avgf_ref[:, :DS] = zero_border
    avgf_ref[:, DS + HW:] = zero_border
    avgf_ref[:, DS:DS + HW] = s_avg
    maxf_ref[:, :DS] = zero_border
    maxf_ref[:, DS + HW:] = zero_border
    maxf_ref[:, DS:DS + HW] = s_max

    # KxK cross-correlation (2 in-channels -> 1 out-channel), zero padding,
    # no bias, fully unrolled VPU FMAs with scalar SMEM weights.  Tap (kh, kw)
    # for flat output position p reads scratch[kh*W + kw + p]; the per-kw lane
    # mask (shared across kh and across both maps) zeroes lanes whose column
    # index wrapped across a row boundary.
    acc = jnp.zeros((Bt, HW), jnp.float32)
    for kw in range(K):
        part = jnp.zeros((Bt, HW), jnp.float32)
        for kh in range(K):
            off = kh * W + kw
            part = part + avgf_ref[:, off:off + HW] * wsp_ref[kh * K + kw]
            part = part + maxf_ref[:, off:off + HW] * wsp_ref[K * K + kh * K + kw]
        acc = acc + part * masks_ref[kw:kw + 1, :]
    sa = jax.nn.sigmoid(acc)                            # (Bt, HW) f32

    sa_b = sa[:, None, :] if upcast_apply else sa[:, None, :].astype(x1.dtype)
    o_ref[...] = (x1 * sa_b).astype(o_ref.dtype)        # lane-dense (Bt, C, HW) store


def _tpu_config():
    """(vmem_limit_bytes, multi_core) for the current TPU generation."""
    vmem_phys = 64 << 20                      # conservative default (v7x per-TC)
    multi_core = False
    try:
        vmem_phys = int(pltpu.get_tpu_info().vmem_capacity_bytes)
    except Exception:
        pass
    try:
        kind = jax.devices()[0].device_kind.lower().replace(" ", "")
        multi_core = any(t in kind for t in ("v7", "v4", "v5p"))
    except Exception:
        pass
    # 64 MiB on 128-MiB parts (v5e/v6e), 32 MiB on 64-MiB parts (v7x).
    vmem_limit = min(vmem_phys // 2, 64 << 20)
    return vmem_limit, multi_core


def _pick_block_batch(B, per_sample_bytes, vmem_limit, multi_core):
    """Largest divisor of B whose full per-step footprint fits the budget."""
    budget = int(vmem_limit * 0.7)            # headroom for scratch / spills
    max_bt = max(1, budget // max(per_sample_bytes, 1))
    bt = 1
    for cand in range(1, B + 1):
        if B % cand == 0 and cand <= max_bt:
            bt = cand
    if multi_core:
        # Prefer an even number (>=2) of grid steps so both TensorCores of a
        # dual-TC chip get equal work; single-TC chips keep the largest fit.
        for cand in range(bt, 0, -1):
            if B % cand == 0 and (B // cand) >= 2 and (B // cand) % 2 == 0:
                bt = cand
                break
    # TODO(synk): batch sizes with no good divisor degrade to Bt=1; a padded /
    # masked-tail batch path would avoid many tiny grid steps.
    return bt


def cbam_pallas(x, w1, w2, wsp, *, kernel_size=7):
    B, C, H, W = x.shape
    HW = H * W
    HID = w1.shape[0]
    K = kernel_size
    pad = (K - 1) // 2
    DS = pad * W + pad
    L = HW + 2 * DS

    # TODO(synk): for production shapes where H*W is not a multiple of 128,
    # pad HW up to a 128 multiple (masking the tail in the pools) so the big
    # (Bt, C, HW) load/store stays unmasked full-lane.
    xf = x.reshape(B, C, HW)              # lane-dense view, free for contiguous NCHW
    w1t = jnp.transpose(w1)               # (C, HID)  -> avoids in-kernel transpose
    w2t = jnp.transpose(w2)               # (HID, C)
    wsp_flat = wsp.reshape(-1)            # (2*K*K,) scalars -> compact 1-D SMEM

    # Per-kw column-validity lane masks for the flat spatial conv.
    cols = jnp.arange(HW, dtype=jnp.int32) % W
    masks = jnp.stack(
        [((cols + (kw - pad) >= 0) & (cols + (kw - pad) < W)).astype(jnp.float32)
         for kw in range(K)], axis=0)     # (K, HW)

    itemsize = jnp.dtype(x.dtype).itemsize
    upcast_apply = (x.dtype != jnp.float32)
    compute_itemsize = 4 if upcast_apply else itemsize
    # double-buffered in + out (native dtype) + live x / x1 values (compute dtype)
    per_sample_bytes = C * HW * (4 * itemsize + 2 * compute_itemsize)

    vmem_limit, multi_core = _tpu_config()
    Bt = _pick_block_batch(B, per_sample_bytes, vmem_limit, multi_core)

    kern = functools.partial(_cbam_kernel, C=C, H=H, W=W, HID=HID, K=K, Bt=Bt,
                             upcast_apply=upcast_apply)
    out = pl.pallas_call(
        kern,
        out_shape=jax.ShapeDtypeStruct((B, C, HW), x.dtype),
        grid=(B // Bt,),
        in_specs=[
            pl.BlockSpec((Bt, C, HW), lambda b: (b, 0, 0)),
            pl.BlockSpec((C, HID), lambda b: (0, 0)),
            pl.BlockSpec((HID, C), lambda b: (0, 0)),
            pl.BlockSpec(memory_space=pltpu.MemorySpace.SMEM),   # (2*K*K,) scalars
            pl.BlockSpec((K, HW), lambda b: (0, 0)),             # per-kw lane masks
        ],
        out_specs=pl.BlockSpec((Bt, C, HW), lambda b: (b, 0, 0)),
        scratch_shapes=[
            pltpu.VMEM((Bt, L), jnp.float32),   # flat zero-bordered channel-avg map
            pltpu.VMEM((Bt, L), jnp.float32),   # flat zero-bordered channel-max map
        ],
        compiler_params=pltpu.CompilerParams(
            dimension_semantics=("parallel",),
            vmem_limit_bytes=vmem_limit,
        ),
    )(xf, w1t, w2t, wsp_flat, masks)
    return out.reshape(B, C, H, W)


def cbam_reference(x, w1, w2, wsp):
    """Pure-JAX reference matching the PyTorch CBAM.forward semantics."""
    avg = jnp.mean(x, axis=(2, 3), keepdims=True)         # (B, C, 1, 1)
    mx = jnp.max(x, axis=(2, 3), keepdims=True)

    def fc(v):
        h = jnp.einsum("bcij,hc->bhij", v, w1)
        h = jnp.maximum(h, 0.0)
        return jnp.einsum("bhij,ch->bcij", h, w2)

    ca = jax.nn.sigmoid(fc(avg) + fc(mx))
    x1 = x * ca
    s_avg = jnp.mean(x1, axis=1, keepdims=True)
    s_max = jnp.max(x1, axis=1, keepdims=True)
    s = jnp.concatenate([s_avg, s_max], axis=1)           # (B, 2, H, W)
    pad = (wsp.shape[-1] - 1) // 2
    sa = jax.lax.conv_general_dilated(
        s, wsp[None], window_strides=(1, 1),
        padding=[(pad, pad), (pad, pad)],
        dimension_numbers=("NCHW", "OIHW", "NCHW"))
    sa = jax.nn.sigmoid(sa)
    return x1 * sa


if __name__ == "__main__":
    # Small shapes consistent with the module: in_channels must be divisible by
    # reduction_ratio=16, so use C=32 (hidden = 32 // 16 = 2).
    B, C, H, W = 2, 32, 16, 16
    reduction_ratio, kernel_size = 16, 7
    HID = C // reduction_ratio

    key = jax.random.PRNGKey(0)
    kx, k1, k2, k3 = jax.random.split(key, 4)
    x = jax.random.normal(kx, (B, C, H, W), dtype=jnp.float32)
    # Conv2d 1x1 weights squeezed to 2D, 7x7 conv weight with out-channel squeezed.
    w1 = jax.random.normal(k1, (HID, C), dtype=jnp.float32) * 0.1   # fc[0]: (C/r, C, 1, 1)
    w2 = jax.random.normal(k2, (C, HID), dtype=jnp.float32) * 0.1   # fc[2]: (C, C/r, 1, 1)
    wsp = jax.random.normal(k3, (2, kernel_size, kernel_size), dtype=jnp.float32) * 0.1

    out = cbam_pallas(x, w1, w2, wsp, kernel_size=kernel_size)
    out = jax.block_until_ready(out)

    ref = cbam_reference(x, w1, w2, wsp)
    assert out.shape == (B, C, H, W)
    assert jnp.allclose(out, ref, rtol=1e-4, atol=1e-4), "mismatch vs JAX reference"

    print("KERNEL_OK")
</pallas_src>

<mosaic_0001>
module attributes {stable_mosaic.version = 11 : i64} {
  func.func @_cbam_kernel(%arg0: i32, %arg1: memref<2x32x256xf32, #tpu.memory_space<vmem>>, %arg2: memref<32x2xf32, #tpu.memory_space<vmem>>, %arg3: memref<2x32xf32, #tpu.memory_space<vmem>>, %arg4: memref<98xf32, #tpu.memory_space<smem>>, %arg5: memref<7x256xf32, #tpu.memory_space<vmem>>, %arg6: memref<2x32x256xf32, #tpu.memory_space<vmem>>, %arg7: memref<2x358xf32, #tpu.memory_space<vmem>>, %arg8: memref<2x358xf32, #tpu.memory_space<vmem>>) attributes {dimension_semantics = [#tpu.dimension_semantics<parallel>], iteration_bounds = array<i64: 1>, scalar_prefetch = 0 : i64, scratch_operands = 2 : i64, tpu.core_type = #tpu.core_type<tc>, window_params = [{transform_indices = @transform_0, window_bounds = array<i64: 2, 32, 256>}, {pipeline_mode = #tpu.pipeline_mode<synchronous>, transform_indices = @transform_1, window_bounds = array<i64: 32, 2>}, {pipeline_mode = #tpu.pipeline_mode<synchronous>, transform_indices = @transform_2, window_bounds = array<i64: 2, 32>}, {transform_indices = @transform_3, window_bounds = array<i64: 98>}, {pipeline_mode = #tpu.pipeline_mode<synchronous>, transform_indices = @transform_4, window_bounds = array<i64: 7, 256>}, {transform_indices = @transform_5, window_bounds = array<i64: 2, 32, 256>}]} {
    %c0 = arith.constant 0 : index
    %c0_0 = arith.constant 0 : index
    %c0_1 = arith.constant 0 : index
    %0 = vector.load %arg1[%c0, %c0_0, %c0_1] : memref<2x32x256xf32, #tpu.memory_space<vmem>>, vector<2x32x256xf32>
    %cst = arith.constant dense<0.000000e+00> : vector<2x32xf32>
    %1 = vector.multi_reduction <add>, %0, %cst [2] : vector<2x32x256xf32> to vector<2x32xf32>
    %cst_2 = arith.constant 2.560000e+02 : f32
    %2 = vector.broadcast %cst_2 : f32 to vector<2x32xf32>
    %3 = arith.divf %1, %2 : vector<2x32xf32>
    %cst_3 = arith.constant dense<0xFF800000> : vector<2x32xf32>
    %4 = vector.multi_reduction <maximumf>, %0, %cst_3 [2] : vector<2x32x256xf32> to vector<2x32xf32>
    %5 = tpu.concatenate %3, %4 in 0 : vector<2x32xf32>, vector<2x32xf32> -> vector<4x32xf32>
    %c0_4 = arith.constant 0 : index
    %c0_5 = arith.constant 0 : index
    %6 = vector.load %arg2[%c0_4, %c0_5] : memref<32x2xf32, #tpu.memory_space<vmem>>, vector<32x2xf32>
    %cst_6 = arith.constant dense<0.000000e+00> : vector<4x2xf32>
    %7 = tpu.matmul %5, %6, %cst_6 {dimension_numbers = #tpu.dot_dimension_numbers<[1], [0], [0], [1], [0, 0, 1, 1], [], []>} : vector<4x32xf32>, vector<32x2xf32>, vector<4x2xf32> -> vector<4x2xf32>
    %cst_7 = arith.constant 0.000000e+00 : f32
    %8 = vector.broadcast %cst_7 : f32 to vector<4x2xf32>
    %9 = arith.maximumf %7, %8 : vector<4x2xf32>
    %c0_8 = arith.constant 0 : index
    %c0_9 = arith.constant 0 : index
    %10 = vector.load %arg3[%c0_8, %c0_9] : memref<2x32xf32, #tpu.memory_space<vmem>>, vector<2x32xf32>
    %cst_10 = arith.constant dense<0.000000e+00> : vector<4x32xf32>
    %11 = tpu.matmul %9, %10, %cst_10 {dimension_numbers = #tpu.dot_dimension_numbers<[1], [0], [0], [1], [0, 0, 1, 1], [], []>} : vector<4x2xf32>, vector<2x32xf32>, vector<4x32xf32> -> vector<4x32xf32>
    %12 = vector.extract_strided_slice %11 {offsets = [0, 0], sizes = [2, 32], strides = [1, 1]} : vector<4x32xf32> to vector<2x32xf32>
    %13 = vector.extract_strided_slice %11 {offsets = [2, 0], sizes = [2, 32], strides = [1, 1]} : vector<4x32xf32> to vector<2x32xf32>
    %14 = arith.addf %12, %13 : vector<2x32xf32>
    %15 = arith.negf %14 : vector<2x32xf32>
    %16 = math.exp %15 : vector<2x32xf32>
    %cst_11 = arith.constant 1.000000e+00 : f32
    %17 = vector.broadcast %cst_11 : f32 to vector<2x32xf32>
    %18 = arith.addf %17, %16 : vector<2x32xf32>
    %19 = arith.divf %17, %18 : vector<2x32xf32>
    %20 = vector.shape_cast %19 : vector<2x32xf32> to vector<2x32x1xf32>
    %21 = vector.broadcast %20 : vector<2x32x1xf32> to vector<2x32x256xf32>
    %22 = arith.mulf %0, %21 : vector<2x32x256xf32>
    %cst_12 = arith.constant dense<0.000000e+00> : vector<2x256xf32>
    %23 = vector.multi_reduction <add>, %22, %cst_12 [1] : vector<2x32x256xf32> to vector<2x256xf32>
    %cst_13 = arith.constant 3.200000e+01 : f32
    %24 = vector.broadcast %cst_13 : f32 to vector<2x256xf32>
    %25 = arith.divf %23, %24 : vector<2x256xf32>
    %cst_14 = arith.constant dense<0xFF800000> : vector<2x256xf32>
    %26 = vector.multi_reduction <maximumf>, %22, %cst_14 [1] : vector<2x32x256xf32> to vector<2x256xf32>
    %cst_15 = arith.constant 0.000000e+00 : f32
    %27 = vector.broadcast %cst_15 : f32 to vector<2x51xf32>
    %c0_16 = arith.constant 0 : index
    %c0_17 = arith.constant 0 : index
    %28 = vector.load %arg7[%c0_16, %c0_17] : memref<2x358xf32, #tpu.memory_space<vmem>>, vector<2x51xf32>
    tpu.vector_store %arg7[%c0_16, %c0_17], %27 {strides = array<i32>} : memref<2x358xf32, #tpu.memory_space<vmem>>, vector<2x51xf32>,
    %c0_18 = arith.constant 0 : index
    %c307 = arith.constant 307 : index
    %29 = vector.load %arg7[%c0_18, %c307] : memref<2x358xf32, #tpu.memory_space<vmem>>, vector<2x51xf32>
    tpu.vector_store %arg7[%c0_18, %c307], %27 {strides = array<i32>} : memref<2x358xf32, #tpu.memory_space<vmem>>, vector<2x51xf32>,
    %c0_19 = arith.constant 0 : index
    %c51 = arith.constant 51 : index
    %30 = vector.load %arg7[%c0_19, %c51] : memref<2x358xf32, #tpu.memory_space<vmem>>, vector<2x256xf32>
    tpu.vector_store %arg7[%c0_19, %c51], %25 {strides = array<i32>} : memref<2x358xf32, #tpu.memory_space<vmem>>, vector<2x256xf32>,
    %c0_20 = arith.constant 0 : index
    %c0_21 = arith.constant 0 : index
    %31 = vector.load %arg8[%c0_20, %c0_21] : memref<2x358xf32, #tpu.memory_space<vmem>>, vector<2x51xf32>
    tpu.vector_store %arg8[%c0_20, %c0_21], %27 {strides = array<i32>} : memref<2x358xf32, #tpu.memory_space<vmem>>, vector<2x51xf32>,
    %c0_22 = arith.constant 0 : index
    %c307_23 = arith.constant 307 : index
    %32 = vector.load %arg8[%c0_22, %c307_23] : memref<2x358xf32, #tpu.memory_space<vmem>>, vector<2x51xf32>
    tpu.vector_store %arg8[%c0_22, %c307_23], %27 {strides = array<i32>} : memref<2x358xf32, #tpu.memory_space<vmem>>, vector<2x51xf32>,
    %c0_24 = arith.constant 0 : index
    %c51_25 = arith.constant 51 : index
    %33 = vector.load %arg8[%c0_24, %c51_25] : memref<2x358xf32, #tpu.memory_space<vmem>>, vector<2x256xf32>
    tpu.vector_store %arg8[%c0_24, %c51_25], %26 {strides = array<i32>} : memref<2x358xf32, #tpu.memory_space<vmem>>, vector<2x256xf32>,
    %cst_26 = arith.constant 0.000000e+00 : f32
    %34 = vector.broadcast %cst_26 : f32 to vector<2x256xf32>
    %cst_27 = arith.constant 0.000000e+00 : f32
    %35 = vector.broadcast %cst_27 : f32 to vector<2x256xf32>
    %c0_28 = arith.constant 0 : index
    %c0_29 = arith.constant 0 : index
    %36 = vector.load %arg7[%c0_28, %c0_29] : memref<2x358xf32, #tpu.memory_space<vmem>>, vector<2x256xf32>
    %c0_30 = arith.constant 0 : index
    %37 = memref.load %arg4[%c0_30] : memref<98xf32, #tpu.memory_space<smem>>
    %38 = vector.broadcast %37 : f32 to vector<2x256xf32>
    %39 = arith.mulf %36, %38 : vector<2x256xf32>
    %40 = arith.addf %35, %39 : vector<2x256xf32>
    %c0_31 = arith.constant 0 : index
    %c0_32 = arith.constant 0 : index
    %41 = vector.load %arg8[%c0_31, %c0_32] : memref<2x358xf32, #tpu.memory_space<vmem>>, vector<2x256xf32>
    %c49 = arith.constant 49 : index
    %42 = memref.load %arg4[%c49] : memref<98xf32, #tpu.memory_space<smem>>
    %43 = vector.broadcast %42 : f32 to vector<2x256xf32>
    %44 = arith.mulf %41, %43 : vector<2x256xf32>
    %45 = arith.addf %40, %44 : vector<2x256xf32>
    %c0_33 = arith.constant 0 : index
    %c16 = arith.constant 16 : index
    %46 = vector.load %arg7[%c0_33, %c16] : memref<2x358xf32, #tpu.memory_space<vmem>>, vector<2x256xf32>
    %c7 = arith.constant 7 : index
    %47 = memref.load %arg4[%c7] : memref<98xf32, #tpu.memory_space<smem>>
    %48 = vector.broadcast %47 : f32 to vector<2x256xf32>
    %49 = arith.mulf %46, %48 : vector<2x256xf32>
    %50 = arith.addf %45, %49 : vector<2x256xf32>
    %c0_34 = arith.constant 0 : index
    %c16_35 = arith.constant 16 : index
    %51 = vector.load %arg8[%c0_34, %c16_35] : memref<2x358xf32, #tpu.memory_space<vmem>>, vector<2x256xf32>
    %c56 = arith.constant 56 : index
    %52 = memref.load %arg4[%c56] : memref<98xf32, #tpu.memory_space<smem>>
    %53 = vector.broadcast %52 : f32 to vector<2x256xf32>
    %54 = arith.mulf %51, %53 : vector<2x256xf32>
    %55 = arith.addf %50, %54 : vector<2x256xf32>
    %c0_36 = arith.constant 0 : index
    %c32 = arith.constant 32 : index
    %56 = vector.load %arg7[%c0_36, %c32] : memref<2x358xf32, #tpu.memory_space<vmem>>, vector<2x256xf32>
    %c14 = arith.constant 14 : index
    %57 = memref.load %arg4[%c14] : memref<98xf32, #tpu.memory_space<smem>>
    %58 = vector.broadcast %57 : f32 to vector<2x256xf32>
    %59 = arith.mulf %56, %58 : vector<2x256xf32>
    %60 = arith.addf %55, %59 : vector<2x256xf32>
    %c0_37 = arith.constant 0 : index
    %c32_38 = arith.constant 32 : index
    %61 = vector.load %arg8[%c0_37, %c32_38] : memref<2x358xf32, #tpu.memory_space<vmem>>, vector<2x256xf32>
    %c63 = arith.constant 63 : index
    %62 = memref.load %arg4[%c63] : memref<98xf32, #tpu.memory_space<smem>>
    %63 = vector.broadcast %62 : f32 to vector<2x256xf32>
    %64 = arith.mulf %61, %63 : vector<2x256xf32>
    %65 = arith.addf %60, %64 : vector<2x256xf32>
    %c0_39 = arith.constant 0 : index
    %c48 = arith.constant 48 : index
    %66 = vector.load %arg7[%c0_39, %c48] : memref<2x358xf32, #tpu.memory_space<vmem>>, vector<2x256xf32>
    %c21 = arith.constant 21 : index
    %67 = memref.load %arg4[%c21] : memref<98xf32, #tpu.memory_space<smem>>
    %68 = vector.broadcast %67 : f32 to vector<2x256xf32>
    %69 = arith.mulf %66, %68 : vector<2x256xf32>
    %70 = arith.addf %65, %69 : vector<2x256xf32>
    %c0_40 = arith.constant 0 : index
    %c48_41 = arith.constant 48 : index
    %71 = vector.load %arg8[%c0_40, %c48_41] : memref<2x358xf32, #tpu.memory_space<vmem>>, vector<2x256xf32>
    %c70 = arith.constant 70 : index
    %72 = memref.load %arg4[%c70] : memref<98xf32, #tpu.memory_space<smem>>
    %73 = vector.broadcast %72 : f32 to vector<2x256xf32>
    %74 = arith.mulf %71, %73 : vector<2x256xf32>
    %75 = arith.addf %70, %74 : vector<2x256xf32>
    %c0_42 = arith.constant 0 : index
    %c64 = arith.constant 64 : index
    %76 = vector.load %arg7[%c0_42, %c64] : memref<2x358xf32, #tpu.memory_space<vmem>>, vector<2x256xf32>
    %c28 = arith.constant 28 : index
    %77 = memref.load %arg4[%c28] : memref<98xf32, #tpu.memory_space<smem>>
    %78 = vector.broadcast %77 : f32 to vector<2x256xf32>
    %79 = arith.mulf %76, %78 : vector<2x256xf32>
    %80 = arith.addf %75, %79 : vector<2x256xf32>
    %c0_43 = arith.constant 0 : index
    %c64_44 = arith.constant 64 : index
    %81 = vector.load %arg8[%c0_43, %c64_44] : memref<2x358xf32, #tpu.memory_space<vmem>>, vector<2x256xf32>
    %c77 = arith.constant 77 : index
    %82 = memref.load %arg4[%c77] : memref<98xf32, #tpu.memory_space<smem>>
    %83 = vector.broadcast %82 : f32 to vector<2x256xf32>
    %84 = arith.mulf %81, %83 : vector<2x256xf32>
    %85 = arith.addf %80, %84 : vector<2x256xf32>
    %c0_45 = arith.constant 0 : index
    %c80 = arith.constant 80 : index
    %86 = vector.load %arg7[%c0_45, %c80] : memref<2x358xf32, #tpu.memory_space<vmem>>, vector<2x256xf32>
    %c35 = arith.constant 35 : index
    %87 = memref.load %arg4[%c35] : memref<98xf32, #tpu.memory_space<smem>>
    %88 = vector.broadcast %87 : f32 to vector<2x256xf32>
    %89 = arith.mulf %86, %88 : vector<2x256xf32>
    %90 = arith.addf %85, %89 : vector<2x256xf32>
    %c0_46 = arith.constant 0 : index
    %c80_47 = arith.constant 80 : index
    %91 = vector.load %arg8[%c0_46, %c80_47] : memref<2x358xf32, #tpu.memory_space<vmem>>, vector<2x256xf32>
    %c84 = arith.constant 84 : index
    %92 = memref.load %arg4[%c84] : memref<98xf32, #tpu.memory_space<smem>>
    %93 = vector.broadcast %92 : f32 to vector<2x256xf32>
    %94 = arith.mulf %91, %93 : vector<2x256xf32>
    %95 = arith.addf %90, %94 : vector<2x256xf32>
    %c0_48 = arith.constant 0 : index
    %c96 = arith.constant 96 : index
    %96 = vector.load %arg7[%c0_48, %c96] : memref<2x358xf32, #tpu.memory_space<vmem>>, vector<2x256xf32>
    %c42 = arith.constant 42 : index
    %97 = memref.load %arg4[%c42] : memref<98xf32, #tpu.memory_space<smem>>
    %98 = vector.broadcast %97 : f32 to vector<2x256xf32>
    %99 = arith.mulf %96, %98 : vector<2x256xf32>
    %100 = arith.addf %95, %99 : vector<2x256xf32>
    %c0_49 = arith.constant 0 : index
    %c96_50 = arith.constant 96 : index
    %101 = vector.load %arg8[%c0_49, %c96_50] : memref<2x358xf32, #tpu.memory_space<vmem>>, vector<2x256xf32>
    %c91 = arith.constant 91 : index
    %102 = memref.load %arg4[%c91] : memref<98xf32, #tpu.memory_space<smem>>
    %103 = vector.broadcast %102 : f32 to vector<2x256xf32>
    %104 = arith.mulf %101, %103 : vector<2x256xf32>
    %105 = arith.addf %100, %104 : vector<2x256xf32>
    %c0_51 = arith.constant 0 : index
    %c0_52 = arith.constant 0 : index
    %106 = vector.load %arg5[%c0_51, %c0_52] : memref<7x256xf32, #tpu.memory_space<vmem>>, vector<1x256xf32>
    %107 = vector.broadcast %106 : vector<1x256xf32> to vector<2x256xf32>
    %108 = arith.mulf %105, %107 : vector<2x256xf32>
    %109 = arith.addf %34, %108 : vector<2x256xf32>
    %cst_53 = arith.constant 0.000000e+00 : f32
    %110 = vector.broadcast %cst_53 : f32 to vector<2x256xf32>
    %c0_54 = arith.constant 0 : index
    %c1 = arith.constant 1 : index
    %111 = vector.load %arg7[%c0_54, %c1] : memref<2x358xf32, #tpu.memory_space<vmem>>, vector<2x256xf32>
    %c1_55 = arith.constant 1 : index
    %112 = memref.load %arg4[%c1_55] : memref<98xf32, #tpu.memory_space<smem>>
    %113 = vector.broadcast %112 : f32 to vector<2x256xf32>
    %114 = arith.mulf %111, %113 : vector<2x256xf32>
    %115 = arith.addf %110, %114 : vector<2x256xf32>
    %c0_56 = arith.constant 0 : index
    %c1_57 = arith.constant 1 : index
    %116 = vector.load %arg8[%c0_56, %c1_57] : memref<2x358xf32, #tpu.memory_space<vmem>>, vector<2x256xf32>
    %c50 = arith.constant 50 : index
    %117 = memref.load %arg4[%c50] : memref<98xf32, #tpu.memory_space<smem>>
    %118 = vector.broadcast %117 : f32 to vector<2x256xf32>
    %119 = arith.mulf %116, %118 : vector<2x256xf32>
    %120 = arith.addf %115, %119 : vector<2x256xf32>
    %c0_58 = arith.constant 0 : index
    %c17 = arith.constant 17 : index
    %121 = vector.load %arg7[%c0_58, %c17] : memref<2x358xf32, #tpu.memory_space<vmem>>, vector<2x256xf32>
    %c8 = arith.constant 8 : index
    %122 = memref.load %arg4[%c8] : memref<98xf32, #tpu.memory_space<smem>>
    %123 = vector.broadcast %122 : f32 to vector<2x256xf32>
    %124 = arith.mulf %121, %123 : vector<2x256xf32>
    %125 = arith.addf %120, %124 : vector<2x256xf32>
    %c0_59 = arith.constant 0 : index
    %c17_60 = arith.constant 17 : index
    %126 = vector.load %arg8[%c0_59, %c17_60] : memref<2x358xf32, #tpu.memory_space<vmem>>, vector<2x256xf32>
    %c57 = arith.constant 57 : index
    %127 = memref.load %arg4[%c57] : memref<98xf32, #tpu.memory_space<smem>>
    %128 = vector.broadcast %127 : f32 to vector<2x256xf32>
    %129 = arith.mulf %126, %128 : vector<2x256xf32>
    %130 = arith.addf %125, %129 : vector<2x256xf32>
    %c0_61 = arith.constant 0 : index
    %c33 = arith.constant 33 : index
    %131 = vector.load %arg7[%c0_61, %c33] : memref<2x358xf32, #tpu.memory_space<vmem>>, vector<2x256xf32>
    %c15 = arith.constant 15 : index
    %132 = memref.load %arg4[%c15] : memref<98xf32, #tpu.memory_space<smem>>
    %133 = vector.broadcast %132 : f32 to vector<2x256xf32>
    %134 = arith.mulf %131, %133 : vector<2x256xf32>
    %135 = arith.addf %130, %134 : vector<2x256xf32>
    %c0_62 = arith.constant 0 : index
    %c33_63 = arith.constant 33 : index
    %136 = vector.load %arg8[%c0_62, %c33_63] : memref<2x358xf32, #tpu.memory_space<vmem>>, vector<2x256xf32>
    %c64_64 = arith.constant 64 : index
    %137 = memref.load %arg4[%c64_64] : memref<98xf32, #tpu.memory_space<smem>>
    %138 = vector.broadcast %137 : f32 to vector<2x256xf32>
    %139 = arith.mulf %136, %138 : vector<2x256xf32>
    %140 = arith.addf %135, %139 : vector<2x256xf32>
    %c0_65 = arith.constant 0 : index
    %c49_66 = arith.constant 49 : index
    %141 = vector.load %arg7[%c0_65, %c49_66] : memref<2x358xf32, #tpu.memory_space<vmem>>, vector<2x256xf32>
    %c22 = arith.constant 22 : index
    %142 = memref.load %arg4[%c22] : memref<98xf32, #tpu.memory_space<smem>>
    %143 = vector.broadcast %142 : f32 to vector<2x256xf32>
    %144 = arith.mulf %141, %143 : vector<2x256xf32>
    %145 = arith.addf %140, %144 : vector<2x256xf32>
    %c0_67 = arith.constant 0 : index
    %c49_68 = arith.constant 49 : index
    %146 = vector.load %arg8[%c0_67, %c49_68] : memref<2x358xf32, #tpu.memory_space<vmem>>, vector<2x256xf32>
    %c71 = arith.constant 71 : index
    %147 = memref.load %arg4[%c71] : memref<98xf32, #tpu.memory_space<smem>>
    %148 = vector.broadcast %147 : f32 to vector<2x256xf32>
    %149 = arith.mulf %146, %148 : vector<2x256xf32>
    %150 = arith.addf %145, %149 : vector<2x256xf32>
    %c0_69 = arith.constant 0 : index
    %c65 = arith.constant 65 : index
    %151 = vector.load %arg7[%c0_69, %c65] : memref<2x358xf32, #tpu.memory_space<vmem>>, vector<2x256xf32>
    %c29 = arith.constant 29 : index
    %152 = memref.load %arg4[%c29] : memref<98xf32, #tpu.memory_space<smem>>
    %153 = vector.broadcast %152 : f32 to vector<2x256xf32>
    %154 = arith.mulf %151, %153 : vector<2x256xf32>
    %155 = arith.addf %150, %154 : vector<2x256xf32>
    %c0_70 = arith.constant 0 : index
    %c65_71 = arith.constant 65 : index
    %156 = vector.load %arg8[%c0_70, %c65_71] : memref<2x358xf32, #tpu.memory_space<vmem>>, vector<2x256xf32>
    %c78 = arith.constant 78 : index
    %157 = memref.load %arg4[%c78] : memref<98xf32, #tpu.memory_space<smem>>
    %158 = vector.broadcast %157 : f32 to vector<2x256xf32>
    %159 = arith.mulf %156, %158 : vector<2x256xf32>
    %160 = arith.addf %155, %159 : vector<2x256xf32>
    %c0_72 = arith.constant 0 : index
    %c81 = arith.constant 81 : index
    %161 = vector.load %arg7[%c0_72, %c81] : memref<2x358xf32, #tpu.memory_space<vmem>>, vector<2x256xf32>
    %c36 = arith.constant 36 : index
    %162 = memref.load %arg4[%c36] : memref<98xf32, #tpu.memory_space<smem>>
    %163 = vector.broadcast %162 : f32 to vector<2x256xf32>
    %164 = arith.mulf %161, %163 : vector<2x256xf32>
    %165 = arith.addf %160, %164 : vector<2x256xf32>
    %c0_73 = arith.constant 0 : index
    %c81_74 = arith.constant 81 : index
    %166 = vector.load %arg8[%c0_73, %c81_74] : memref<2x358xf32, #tpu.memory_space<vmem>>, vector<2x256xf32>
    %c85 = arith.constant 85 : index
    %167 = memref.load %arg4[%c85] : memref<98xf32, #tpu.memory_space<smem>>
    %168 = vector.broadcast %167 : f32 to vector<2x256xf32>
    %169 = arith.mulf %166, %168 : vector<2x256xf32>
    %170 = arith.addf %165, %169 : vector<2x256xf32>
    %c0_75 = arith.constant 0 : index
    %c97 = arith.constant 97 : index
    %171 = vector.load %arg7[%c0_75, %c97] : memref<2x358xf32, #tpu.memory_space<vmem>>, vector<2x256xf32>
    %c43 = arith.constant 43 : index
    %172 = memref.load %arg4[%c43] : memref<98xf32, #tpu.memory_space<smem>>
    %173 = vector.broadcast %172 : f32 to vector<2x256xf32>
    %174 = arith.mulf %171, %173 : vector<2x256xf32>
    %175 = arith.addf %170, %174 : vector<2x256xf32>
    %c0_76 = arith.constant 0 : index
    %c97_77 = arith.constant 97 : index
    %176 = vector.load %arg8[%c0_76, %c97_77] : memref<2x358xf32, #tpu.memory_space<vmem>>, vector<2x256xf32>
    %c92 = arith.constant 92 : index
    %177 = memref.load %arg4[%c92] : memref<98xf32, #tpu.memory_space<smem>>
    %178 = vector.broadcast %177 : f32 to vector<2x256xf32>
    %179 = arith.mulf %176, %178 : vector<2x256xf32>
    %180 = arith.addf %175, %179 : vector<2x256xf32>
    %c1_78 = arith.constant 1 : index
    %c0_79 = arith.constant 0 : index
    %181 = vector.load %arg5[%c1_78, %c0_79] : memref<7x256xf32, #tpu.memory_space<vmem>>, vector<1x256xf32>
    %182 = vector.broadcast %181 : vector<1x256xf32> to vector<2x256xf32>
    %183 = arith.mulf %180, %182 : vector<2x256xf32>
    %184 = arith.addf %109, %183 : vector<2x256xf32>
    %cst_80 = arith.constant 0.000000e+00 : f32
    %185 = vector.broadcast %cst_80 : f32 to vector<2x256xf32>
    %c0_81 = arith.constant 0 : index
    %c2 = arith.constant 2 : index
    %186 = vector.load %arg7[%c0_81, %c2] : memref<2x358xf32, #tpu.memory_space<vmem>>, vector<2x256xf32>
    %c2_82 = arith.constant 2 : index
    %187 = memref.load %arg4[%c2_82] : memref<98xf32, #tpu.memory_space<smem>>
    %188 = vector.broadcast %187 : f32 to vector<2x256xf32>
    %189 = arith.mulf %186, %188 : vector<2x256xf32>
    %190 = arith.addf %185, %189 : vector<2x256xf32>
    %c0_83 = arith.constant 0 : index
    %c2_84 = arith.constant 2 : index
    %191 = vector.load %arg8[%c0_83, %c2_84] : memref<2x358xf32, #tpu.memory_space<vmem>>, vector<2x256xf32>
    %c51_85 = arith.constant 51 : index
    %192 = memref.load %arg4[%c51_85] : memref<98xf32, #tpu.memory_space<smem>>
    %193 = vector.broadcast %192 : f32 to vector<2x256xf32>
    %194 = arith.mulf %191, %193 : vector<2x256xf32>
    %195 = arith.addf %190, %194 : vector<2x256xf32>
    %c0_86 = arith.constant 0 : index
    %c18 = arith.constant 18 : index
    %196 = vector.load %arg7[%c0_86, %c18] : memref<2x358xf32, #tpu.memory_space<vmem>>, vector<2x256xf32>
    %c9 = arith.constant 9 : index
    %197 = memref.load %arg4[%c9] : memref<98xf32, #tpu.memory_space<smem>>
    %198 = vector.broadcast %197 : f32 to vector<2x256xf32>
    %199 = arith.mulf %196, %198 : vector<2x256xf32>
    %200 = arith.addf %195, %199 : vector<2x256xf32>
    %c0_87 = arith.constant 0 : index
    %c18_88 = arith.constant 18 : index
    %201 = vector.load %arg8[%c0_87, %c18_88] : memref<2x358xf32, #tpu.memory_space<vmem>>, vector<2x256xf32>
    %c58 = arith.constant 58 : index
    %202 = memref.load %arg4[%c58] : memref<98xf32, #tpu.memory_space<smem>>
    %203 = vector.broadcast %202 : f32 to vector<2x256xf32>
    %204 = arith.mulf %201, %203 : vector<2x256xf32>
    %205 = arith.addf %200, %204 : vector<2x256xf32>
    %c0_89 = arith.constant 0 : index
    %c34 = arith.constant 34 : index
    %206 = vector.load %arg7[%c0_89, %c34] : memref<2x358xf32, #tpu.memory_space<vmem>>, vector<2x256xf32>
    %c16_90 = arith.constant 16 : index
    %207 = memref.load %arg4[%c16_90] : memref<98xf32, #tpu.memory_space<smem>>
    %208 = vector.broadcast %207 : f32 to vector<2x256xf32>
    %209 = arith.mulf %206, %208 : vector<2x256xf32>
    %210 = arith.addf %205, %209 : vector<2x256xf32>
    %c0_91 = arith.constant 0 : index
    %c34_92 = arith.constant 34 : index
    %211 = vector.load %arg8[%c0_91, %c34_92] : memref<2x358xf32, #tpu.memory_space<vmem>>, vector<2x256xf32>
    %c65_93 = arith.constant 65 : index
    %212 = memref.load %arg4[%c65_93] : memref<98xf32, #tpu.memory_space<smem>>
    %213 = vector.broadcast %212 : f32 to vector<2x256xf32>
    %214 = arith.mulf %211, %213 : vector<2x256xf32>
    %215 = arith.addf %210, %214 : vector<2x256xf32>
    %c0_94 = arith.constant 0 : index
    %c50_95 = arith.constant 50 : index
    %216 = vector.load %arg7[%c0_94, %c50_95] : memref<2x358xf32, #tpu.memory_space<vmem>>, vector<2x256xf32>
    %c23 = arith.constant 23 : index
    %217 = memref.load %arg4[%c23] : memref<98xf32, #tpu.memory_space<smem>>
    %218 = vector.broadcast %217 : f32 to vector<2x256xf32>
    %219 = arith.mulf %216, %218 : vector<2x256xf32>
    %220 = arith.addf %215, %219 : vector<2x256xf32>
    %c0_96 = arith.constant 0 : index
    %c50_97 = arith.constant 50 : index
    %221 = vector.load %arg8[%c0_96, %c50_97] : memref<2x358xf32, #tpu.memory_space<vmem>>, vector<2x256xf32>
    %c72 = arith.constant 72 : index
    %222 = memref.load %arg4[%c72] : memref<98xf32, #tpu.memory_space<smem>>
    %223 = vector.broadcast %222 : f32 to vector<2x256xf32>
    %224 = arith.mulf %221, %223 : vector<2x256xf32>
    %225 = arith.addf %220, %224 : vector<2x256xf32>
    %c0_98 = arith.constant 0 : index
    %c66 = arith.constant 66 : index
    %226 = vector.load %arg7[%c0_98, %c66] : memref<2x358xf32, #tpu.memory_space<vmem>>, vector<2x256xf32>
    %c30 = arith.constant 30 : index
    %227 = memref.load %arg4[%c30] : memref<98xf32, #tpu.memory_space<smem>>
    %228 = vector.broadcast %227 : f32 to vector<2x256xf32>
    %229 = arith.mulf %226, %228 : vector<2x256xf32>
    %230 = arith.addf %225, %229 : vector<2x256xf32>
    %c0_99 = arith.constant 0 : index
    %c66_100 = arith.constant 66 : index
    %231 = vector.load %arg8[%c0_99, %c66_100] : memref<2x358xf32, #tpu.memory_space<vmem>>, vector<2x256xf32>
    %c79 = arith.constant 79 : index
    %232 = memref.load %arg4[%c79] : memref<98xf32, #tpu.memory_space<smem>>
    %233 = vector.broadcast %232 : f32 to vector<2x256xf32>
    %234 = arith.mulf %231, %233 : vector<2x256xf32>
    %235 = arith.addf %230, %234 : vector<2x256xf32>
    %c0_101 = arith.constant 0 : index
    %c82 = arith.constant 82 : index
    %236 = vector.load %arg7[%c0_101, %c82] : memref<2x358xf32, #tpu.memory_space<vmem>>, vector<2x256xf32>
    %c37 = arith.constant 37 : index
    %237 = memref.load %arg4[%c37] : memref<98xf32, #tpu.memory_space<smem>>
    %238 = vector.broadcast %237 : f32 to vector<2x256xf32>
    %239 = arith.mulf %236, %238 : vector<2x256xf32>
    %240 = arith.addf %235, %239 : vector<2x256xf32>
    %c0_102 = arith.constant 0 : index
    %c82_103 = arith.constant 82 : index
    %241 = vector.load %arg8[%c0_102, %c82_103] : memref<2x358xf32, #tpu.memory_space<vmem>>, vector<2x256xf32>
    %c86 = arith.constant 86 : index
    %242 = memref.load %arg4[%c86] : memref<98xf32, #tpu.memory_space<smem>>
    %243 = vector.broadcast %242 : f32 to vector<2x256xf32>
    %244 = arith.mulf %241, %243 : vector<2x256xf32>
    %245 = arith.addf %240, %244 : vector<2x256xf32>
    %c0_104 = arith.constant 0 : index
    %c98 = arith.constant 98 : index
    %246 = vector.load %arg7[%c0_104, %c98] : memref<2x358xf32, #tpu.memory_space<vmem>>, vector<2x256xf32>
    %c44 = arith.constant 44 : index
    %247 = memref.load %arg4[%c44] : memref<98xf32, #tpu.memory_space<smem>>
    %248 = vector.broadcast %247 : f32 to vector<2x256xf32>
    %249 = arith.mulf %246, %248 : vector<2x256xf32>
    %250 = arith.addf %245, %249 : vector<2x256xf32>
    %c0_105 = arith.constant 0 : index
    %c98_106 = arith.constant 98 : index
    %251 = vector.load %arg8[%c0_105, %c98_106] : memref<2x358xf32, #tpu.memory_space<vmem>>, vector<2x256xf32>
    %c93 = arith.constant 93 : index
    %252 = memref.load %arg4[%c93] : memref<98xf32, #tpu.memory_space<smem>>
    %253 = vector.broadcast %252 : f32 to vector<2x256xf32>
    %254 = arith.mulf %251, %253 : vector<2x256xf32>
    %255 = arith.addf %250, %254 : vector<2x256xf32>
    %c2_107 = arith.constant 2 : index
    %c0_108 = arith.constant 0 : index
    %256 = vector.load %arg5[%c2_107, %c0_108] : memref<7x256xf32, #tpu.memory_space<vmem>>, vector<1x256xf32>
    %257 = vector.broadcast %256 : vector<1x256xf32> to vector<2x256xf32>
    %258 = arith.mulf %255, %257 : vector<2x256xf32>
    %259 = arith.addf %184, %258 : vector<2x256xf32>
    %cst_109 = arith.constant 0.000000e+00 : f32
    %260 = vector.broadcast %cst_109 : f32 to vector<2x256xf32>
    %c0_110 = arith.constant 0 : index
    %c3 = arith.constant 3 : index
    %261 = vector.load %arg7[%c0_110, %c3] : memref<2x358xf32, #tpu.memory_space<vmem>>, vector<2x256xf32>
    %c3_111 = arith.constant 3 : index
    %262 = memref.load %arg4[%c3_111] : memref<98xf32, #tpu.memory_space<smem>>
    %263 = vector.broadcast %262 : f32 to vector<2x256xf32>
    %264 = arith.mulf %261, %263 : vector<2x256xf32>
    %265 = arith.addf %260, %264 : vector<2x256xf32>
    %c0_112 = arith.constant 0 : index
    %c3_113 = arith.constant 3 : index
    %266 = vector.load %arg8[%c0_112, %c3_113] : memref<2x358xf32, #tpu.memory_space<vmem>>, vector<2x256xf32>
    %c52 = arith.constant 52 : index
    %267 = memref.load %arg4[%c52] : memref<98xf32, #tpu.memory_space<smem>>
    %268 = vector.broadcast %267 : f32 to vector<2x256xf32>
    %269 = arith.mulf %266, %268 : vector<2x256xf32>
    %270 = arith.addf %265, %269 : vector<2x256xf32>
    %c0_114 = arith.constant 0 : index
    %c19 = arith.constant 19 : index
    %271 = vector.load %arg7[%c0_114, %c19] : memref<2x358xf32, #tpu.memory_space<vmem>>, vector<2x256xf32>
    %c10 = arith.constant 10 : index
    %272 = memref.load %arg4[%c10] : memref<98xf32, #tpu.memory_space<smem>>
    %273 = vector.broadcast %272 : f32 to vector<2x256xf32>
    %274 = arith.mulf %271, %273 : vector<2x256xf32>
    %275 = arith.addf %270, %274 : vector<2x256xf32>
    %c0_115 = arith.constant 0 : index
    %c19_116 = arith.constant 19 : index
    %276 = vector.load %arg8[%c0_115, %c19_116] : memref<2x358xf32, #tpu.memory_space<vmem>>, vector<2x256xf32>
    %c59 = arith.constant 59 : index
    %277 = memref.load %arg4[%c59] : memref<98xf32, #tpu.memory_space<smem>>
    %278 = vector.broadcast %277 : f32 to vector<2x256xf32>
    %279 = arith.mulf %276, %278 : vector<2x256xf32>
    %280 = arith.addf %275, %279 : vector<2x256xf32>
    %c0_117 = arith.constant 0 : index
    %c35_118 = arith.constant 35 : index
    %281 = vector.load %arg7[%c0_117, %c35_118] : memref<2x358xf32, #tpu.memory_space<vmem>>, vector<2x256xf32>
    %c17_119 = arith.constant 17 : index
    %282 = memref.load %arg4[%c17_119] : memref<98xf32, #tpu.memory_space<smem>>
    %283 = vector.broadcast %282 : f32 to vector<2x256xf32>
    %284 = arith.mulf %281, %283 : vector<2x256xf32>
    %285 = arith.addf %280, %284 : vector<2x256xf32>
    %c0_120 = arith.constant 0 : index
    %c35_121 = arith.constant 35 : index
    %286 = vector.load %arg8[%c0_120, %c35_121] : memref<2x358xf32, #tpu.memory_space<vmem>>, vector<2x256xf32>
    %c66_122 = arith.constant 66 : index
    %287 = memref.load %arg4[%c66_122] : memref<98xf32, #tpu.memory_space<smem>>
    %288 = vector.broadcast %287 : f32 to vector<2x256xf32>
    %289 = arith.mulf %286, %288 : vector<2x256xf32>
    %290 = arith.addf %285, %289 : vector<2x256xf32>
    %c0_123 = arith.constant 0 : index
    %c51_124 = arith.constant 51 : index
    %291 = vector.load %arg7[%c0_123, %c51_124] : memref<2x358xf32, #tpu.memory_space<vmem>>, vector<2x256xf32>
    %c24 = arith.constant 24 : index
    %292 = memref.load %arg4[%c24] : memref<98xf32, #tpu.memory_space<smem>>
    %293 = vector.broadcast %292 : f32 to vector<2x256xf32>
    %294 = arith.mulf %291, %293 : vector<2x256xf32>
    %295 = arith.addf %290, %294 : vector<2x256xf32>
    %c0_125 = arith.constant 0 : index
    %c51_126 = arith.constant 51 : index
    %296 = vector.load %arg8[%c0_125, %c51_126] : memref<2x358xf32, #tpu.memory_space<vmem>>, vector<2x256xf32>
    %c73 = arith.constant 73 : index
    %297 = memref.load %arg4[%c73] : memref<98xf32, #tpu.memory_space<smem>>
    %298 = vector.broadcast %297 : f32 to vector<2x256xf32>
    %299 = arith.mulf %296, %298 : vector<2x256xf32>
    %300 = arith.addf %295, %299 : vector<2x256xf32>
    %c0_127 = arith.constant 0 : index
    %c67 = arith.constant 67 : index
    %301 = vector.load %arg7[%c0_127, %c67] : memref<2x358xf32, #tpu.memory_space<vmem>>, vector<2x256xf32>
    %c31 = arith.constant 31 : index
    %302 = memref.load %arg4[%c31] : memref<98xf32, #tpu.memory_space<smem>>
    %303 = vector.broadcast %302 : f32 to vector<2x256xf32>
    %304 = arith.mulf %301, %303 : vector<2x256xf32>
    %305 = arith.addf %300, %304 : vector<2x256xf32>
    %c0_128 = arith.constant 0 : index
    %c67_129 = arith.constant 67 : index
    %306 = vector.load %arg8[%c0_128, %c67_129] : memref<2x358xf32, #tpu.memory_space<vmem>>, vector<2x256xf32>
    %c80_130 = arith.constant 80 : index
    %307 = memref.load %arg4[%c80_130] : memref<98xf32, #tpu.memory_space<smem>>
    %308 = vector.broadcast %307 : f32 to vector<2x256xf32>
    %309 = arith.mulf %306, %308 : vector<2x256xf32>
    %310 = arith.addf %305, %309 : vector<2x256xf32>
    %c0_131 = arith.constant 0 : index
    %c83 = arith.constant 83 : index
    %311 = vector.load %arg7[%c0_131, %c83] : memref<2x358xf32, #tpu.memory_space<vmem>>, vector<2x256xf32>
    %c38 = arith.constant 38 : index
    %312 = memref.load %arg4[%c38] : memref<98xf32, #tpu.memory_space<smem>>
    %313 = vector.broadcast %312 : f32 to vector<2x256xf32>
    %314 = arith.mulf %311, %313 : vector<2x256xf32>
    %315 = arith.addf %310, %314 : vector<2x256xf32>
    %c0_132 = arith.constant 0 : index
    %c83_133 = arith.constant 83 : index
    %316 = vector.load %arg8[%c0_132, %c83_133] : memref<2x358xf32, #tpu.memory_space<vmem>>, vector<2x256xf32>
    %c87 = arith.constant 87 : index
    %317 = memref.load %arg4[%c87] : memref<98xf32, #tpu.memory_space<smem>>
    %318 = vector.broadcast %317 : f32 to vector<2x256xf32>
    %319 = arith.mulf %316, %318 : vector<2x256xf32>
    %320 = arith.addf %315, %319 : vector<2x256xf32>
    %c0_134 = arith.constant 0 : index
    %c99 = arith.constant 99 : index
    %321 = vector.load %arg7[%c0_134, %c99] : memref<2x358xf32, #tpu.memory_space<vmem>>, vector<2x256xf32>
    %c45 = arith.constant 45 : index
    %322 = memref.load %arg4[%c45] : memref<98xf32, #tpu.memory_space<smem>>
    %323 = vector.broadcast %322 : f32 to vector<2x256xf32>
    %324 = arith.mulf %321, %323 : vector<2x256xf32>
    %325 = arith.addf %320, %324 : vector<2x256xf32>
    %c0_135 = arith.constant 0 : index
    %c99_136 = arith.constant 99 : index
    %326 = vector.load %arg8[%c0_135, %c99_136] : memref<2x358xf32, #tpu.memory_space<vmem>>, vector<2x256xf32>
    %c94 = arith.constant 94 : index
    %327 = memref.load %arg4[%c94] : memref<98xf32, #tpu.memory_space<smem>>
    %328 = vector.broadcast %327 : f32 to vector<2x256xf32>
    %329 = arith.mulf %326, %328 : vector<2x256xf32>
    %330 = arith.addf %325, %329 : vector<2x256xf32>
    %c3_137 = arith.constant 3 : index
    %c0_138 = arith.constant 0 : index
    %331 = vector.load %arg5[%c3_137, %c0_138] : memref<7x256xf32, #tpu.memory_space<vmem>>, vector<1x256xf32>
    %332 = vector.broadcast %331 : vector<1x256xf32> to vector<2x256xf32>
    %333 = arith.mulf %330, %332 : vector<2x256xf32>
    %334 = arith.addf %259, %333 : vector<2x256xf32>
    %cst_139 = arith.constant 0.000000e+00 : f32
    %335 = vector.broadcast %cst_139 : f32 to vector<2x256xf32>
    %c0_140 = arith.constant 0 : index
    %c4 = arith.constant 4 : index
    %336 = vector.load %arg7[%c0_140, %c4] : memref<2x358xf32, #tpu.memory_space<vmem>>, vector<2x256xf32>
    %c4_141 = arith.constant 4 : index
    %337 = memref.load %arg4[%c4_141] : memref<98xf32, #tpu.memory_space<smem>>
    %338 = vector.broadcast %337 : f32 to vector<2x256xf32>
    %339 = arith.mulf %336, %338 : vector<2x256xf32>
    %340 = arith.addf %335, %339 : vector<2x256xf32>
    %c0_142 = arith.constant 0 : index
    %c4_143 = arith.constant 4 : index
    %341 = vector.load %arg8[%c0_142, %c4_143] : memref<2x358xf32, #tpu.memory_space<vmem>>, vector<2x256xf32>
    %c53 = arith.constant 53 : index
    %342 = memref.load %arg4[%c53] : memref<98xf32, #tpu.memory_space<smem>>
    %343 = vector.broadcast %342 : f32 to vector<2x256xf32>
    %344 = arith.mulf %341, %343 : vector<2x256xf32>
    %345 = arith.addf %340, %344 : vector<2x256xf32>
    %c0_144 = arith.constant 0 : index
    %c20 = arith.constant 20 : index
    %346 = vector.load %arg7[%c0_144, %c20] : memref<2x358xf32, #tpu.memory_space<vmem>>, vector<2x256xf32>
    %c11 = arith.constant 11 : index
    %347 = memref.load %arg4[%c11] : memref<98xf32, #tpu.memory_space<smem>>
    %348 = vector.broadcast %347 : f32 to vector<2x256xf32>
    %349 = arith.mulf %346, %348 : vector<2x256xf32>
    %350 = arith.addf %345, %349 : vector<2x256xf32>
    %c0_145 = arith.constant 0 : index
    %c20_146 = arith.constant 20 : index
    %351 = vector.load %arg8[%c0_145, %c20_146] : memref<2x358xf32, #tpu.memory_space<vmem>>, vector<2x256xf32>
    %c60 = arith.constant 60 : index
    %352 = memref.load %arg4[%c60] : memref<98xf32, #tpu.memory_space<smem>>
    %353 = vector.broadcast %352 : f32 to vector<2x256xf32>
    %354 = arith.mulf %351, %353 : vector<2x256xf32>
    %355 = arith.addf %350, %354 : vector<2x256xf32>
    %c0_147 = arith.constant 0 : index
    %c36_148 = arith.constant 36 : index
    %356 = vector.load %arg7[%c0_147, %c36_148] : memref<2x358xf32, #tpu.memory_space<vmem>>, vector<2x256xf32>
    %c18_149 = arith.constant 18 : index
    %357 = memref.load %arg4[%c18_149] : memref<98xf32, #tpu.memory_space<smem>>
    %358 = vector.broadcast %357 : f32 to vector<2x256xf32>
    %359 = arith.mulf %356, %358 : vector<2x256xf32>
    %360 = arith.addf %355, %359 : vector<2x256xf32>
    %c0_150 = arith.constant 0 : index
    %c36_151 = arith.constant 36 : index
    %361 = vector.load %arg8[%c0_150, %c36_151] : memref<2x358xf32, #tpu.memory_space<vmem>>, vector<2x256xf32>
    %c67_152 = arith.constant 67 : index
    %362 = memref.load %arg4[%c67_152] : memref<98xf32, #tpu.memory_space<smem>>
    %363 = vector.broadcast %362 : f32 to vector<2x256xf32>
    %364 = arith.mulf %361, %363 : vector<2x256xf32>
    %365 = arith.addf %360, %364 : vector<2x256xf32>
    %c0_153 = arith.constant 0 : index
    %c52_154 = arith.constant 52 : index
    %366 = vector.load %arg7[%c0_153, %c52_154] : memref<2x358xf32, #tpu.memory_space<vmem>>, vector<2x256xf32>
    %c25 = arith.constant 25 : index
    %367 = memref.load %arg4[%c25] : memref<98xf32, #tpu.memory_space<smem>>
    %368 = vector.broadcast %367 : f32 to vector<2x256xf32>
    %369 = arith.mulf %366, %368 : vector<2x256xf32>
    %370 = arith.addf %365, %369 : vector<2x256xf32>
    %c0_155 = arith.constant 0 : index
    %c52_156 = arith.constant 52 : index
    %371 = vector.load %arg8[%c0_155, %c52_156] : memref<2x358xf32, #tpu.memory_space<vmem>>, vector<2x256xf32>
    %c74 = arith.constant 74 : index
    %372 = memref.load %arg4[%c74] : memref<98xf32, #tpu.memory_space<smem>>
    %373 = vector.broadcast %372 : f32 to vector<2x256xf32>
    %374 = arith.mulf %371, %373 : vector<2x256xf32>
    %375 = arith.addf %370, %374 : vector<2x256xf32>
    %c0_157 = arith.constant 0 : index
    %c68 = arith.constant 68 : index
    %376 = vector.load %arg7[%c0_157, %c68] : memref<2x358xf32, #tpu.memory_space<vmem>>, vector<2x256xf32>
    %c32_158 = arith.constant 32 : index
    %377 = memref.load %arg4[%c32_158] : memref<98xf32, #tpu.memory_space<smem>>
    %378 = vector.broadcast %377 : f32 to vector<2x256xf32>
    %379 = arith.mulf %376, %378 : vector<2x256xf32>
    %380 = arith.addf %375, %379 : vector<2x256xf32>
    %c0_159 = arith.constant 0 : index
    %c68_160 = arith.constant 68 : index
    %381 = vector.load %arg8[%c0_159, %c68_160] : memref<2x358xf32, #tpu.memory_space<vmem>>, vector<2x256xf32>
    %c81_161 = arith.constant 81 : index
    %382 = memref.load %arg4[%c81_161] : memref<98xf32, #tpu.memory_space<smem>>
    %383 = vector.broadcast %382 : f32 to vector<2x256xf32>
    %384 = arith.mulf %381, %383 : vector<2x256xf32>
    %385 = arith.addf %380, %384 : vector<2x256xf32>
    %c0_162 = arith.constant 0 : index
    %c84_163 = arith.constant 84 : index
    %386 = vector.load %arg7[%c0_162, %c84_163] : memref<2x358xf32, #tpu.memory_space<vmem>>, vector<2x256xf32>
    %c39 = arith.constant 39 : index
    %387 = memref.load %arg4[%c39] : memref<98xf32, #tpu.memory_space<smem>>
    %388 = vector.broadcast %387 : f32 to vector<2x256xf32>
    %389 = arith.mulf %386, %388 : vector<2x256xf32>
    %390 = arith.addf %385, %389 : vector<2x256xf32>
    %c0_164 = arith.constant 0 : index
    %c84_165 = arith.constant 84 : index
    %391 = vector.load %arg8[%c0_164, %c84_165] : memref<2x358xf32, #tpu.memory_space<vmem>>, vector<2x256xf32>
    %c88 = arith.constant 88 : index
    %392 = memref.load %arg4[%c88] : memref<98xf32, #tpu.memory_space<smem>>
    %393 = vector.broadcast %392 : f32 to vector<2x256xf32>
    %394 = arith.mulf %391, %393 : vector<2x256xf32>
    %395 = arith.addf %390, %394 : vector<2x256xf32>
    %c0_166 = arith.constant 0 : index
    %c100 = arith.constant 100 : index
    %396 = vector.load %arg7[%c0_166, %c100] : memref<2x358xf32, #tpu.memory_space<vmem>>, vector<2x256xf32>
    %c46 = arith.constant 46 : index
    %397 = memref.load %arg4[%c46] : memref<98xf32, #tpu.memory_space<smem>>
    %398 = vector.broadcast %397 : f32 to vector<2x256xf32>
    %399 = arith.mulf %396, %398 : vector<2x256xf32>
    %400 = arith.addf %395, %399 : vector<2x256xf32>
    %c0_167 = arith.constant 0 : index
    %c100_168 = arith.constant 100 : index
    %401 = vector.load %arg8[%c0_167, %c100_168] : memref<2x358xf32, #tpu.memory_space<vmem>>, vector<2x256xf32>
    %c95 = arith.constant 95 : index
    %402 = memref.load %arg4[%c95] : memref<98xf32, #tpu.memory_space<smem>>
    %403 = vector.broadcast %402 : f32 to vector<2x256xf32>
    %404 = arith.mulf %401, %403 : vector<2x256xf32>
    %405 = arith.addf %400, %404 : vector<2x256xf32>
    %c4_169 = arith.constant 4 : index
    %c0_170 = arith.constant 0 : index
    %406 = vector.load %arg5[%c4_169, %c0_170] : memref<7x256xf32, #tpu.memory_space<vmem>>, vector<1x256xf32>
    %407 = vector.broadcast %406 : vector<1x256xf32> to vector<2x256xf32>
    %408 = arith.mulf %405, %407 : vector<2x256xf32>
    %409 = arith.addf %334, %408 : vector<2x256xf32>
    %cst_171 = arith.constant 0.000000e+00 : f32
    %410 = vector.broadcast %cst_171 : f32 to vector<2x256xf32>
    %c0_172 = arith.constant 0 : index
    %c5 = arith.constant 5 : index
    %411 = vector.load %arg7[%c0_172, %c5] : memref<2x358xf32, #tpu.memory_space<vmem>>, vector<2x256xf32>
    %c5_173 = arith.constant 5 : index
    %412 = memref.load %arg4[%c5_173] : memref<98xf32, #tpu.memory_space<smem>>
    %413 = vector.broadcast %412 : f32 to vector<2x256xf32>
    %414 = arith.mulf %411, %413 : vector<2x256xf32>
    %415 = arith.addf %410, %414 : vector<2x256xf32>
    %c0_174 = arith.constant 0 : index
    %c5_175 = arith.constant 5 : index
    %416 = vector.load %arg8[%c0_174, %c5_175] : memref<2x358xf32, #tpu.memory_space<vmem>>, vector<2x256xf32>
    %c54 = arith.constant 54 : index
    %417 = memref.load %arg4[%c54] : memref<98xf32, #tpu.memory_space<smem>>
    %418 = vector.broadcast %417 : f32 to vector<2x256xf32>
    %419 = arith.mulf %416, %418 : vector<2x256xf32>
    %420 = arith.addf %415, %419 : vector<2x256xf32>
    %c0_176 = arith.constant 0 : index
    %c21_177 = arith.constant 21 : index
    %421 = vector.load %arg7[%c0_176, %c21_177] : memref<2x358xf32, #tpu.memory_space<vmem>>, vector<2x256xf32>
    %c12 = arith.constant 12 : index
    %422 = memref.load %arg4[%c12] : memref<98xf32, #tpu.memory_space<smem>>
    %423 = vector.broadcast %422 : f32 to vector<2x256xf32>
    %424 = arith.mulf %421, %423 : vector<2x256xf32>
    %425 = arith.addf %420, %424 : vector<2x256xf32>
    %c0_178 = arith.constant 0 : index
    %c21_179 = arith.constant 21 : index
    %426 = vector.load %arg8[%c0_178, %c21_179] : memref<2x358xf32, #tpu.memory_space<vmem>>, vector<2x256xf32>
    %c61 = arith.constant 61 : index
    %427 = memref.load %arg4[%c61] : memref<98xf32, #tpu.memory_space<smem>>
    %428 = vector.broadcast %427 : f32 to vector<2x256xf32>
    %429 = arith.mulf %426, %428 : vector<2x256xf32>
    %430 = arith.addf %425, %429 : vector<2x256xf32>
    %c0_180 = arith.constant 0 : index
    %c37_181 = arith.constant 37 : index
    %431 = vector.load %arg7[%c0_180, %c37_181] : memref<2x358xf32, #tpu.memory_space<vmem>>, vector<2x256xf32>
    %c19_182 = arith.constant 19 : index
    %432 = memref.load %arg4[%c19_182] : memref<98xf32, #tpu.memory_space<smem>>
    %433 = vector.broadcast %432 : f32 to vector<2x256xf32>
    %434 = arith.mulf %431, %433 : vector<2x256xf32>
    %435 = arith.addf %430, %434 : vector<2x256xf32>
    %c0_183 = arith.constant 0 : index
    %c37_184 = arith.constant 37 : index
    %436 = vector.load %arg8[%c0_183, %c37_184] : memref<2x358xf32, #tpu.memory_space<vmem>>, vector<2x256xf32>
    %c68_185 = arith.constant 68 : index
    %437 = memref.load %arg4[%c68_185] : memref<98xf32, #tpu.memory_space<smem>>
    %438 = vector.broadcast %437 : f32 to vector<2x256xf32>
    %439 = arith.mulf %436, %438 : vector<2x256xf32>
    %440 = arith.addf %435, %439 : vector<2x256xf32>
    %c0_186 = arith.constant 0 : index
    %c53_187 = arith.constant 53 : index
    %441 = vector.load %arg7[%c0_186, %c53_187] : memref<2x358xf32, #tpu.memory_space<vmem>>, vector<2x256xf32>
    %c26 = arith.constant 26 : index
    %442 = memref.load %arg4[%c26] : memref<98xf32, #tpu.memory_space<smem>>
    %443 = vector.broadcast %442 : f32 to vector<2x256xf32>
    %444 = arith.mulf %441, %443 : vector<2x256xf32>
    %445 = arith.addf %440, %444 : vector<2x256xf32>
    %c0_188 = arith.constant 0 : index
    %c53_189 = arith.constant 53 : index
    %446 = vector.load %arg8[%c0_188, %c53_189] : memref<2x358xf32, #tpu.memory_space<vmem>>, vector<2x256xf32>
    %c75 = arith.constant 75 : index
    %447 = memref.load %arg4[%c75] : memref<98xf32, #tpu.memory_space<smem>>
    %448 = vector.broadcast %447 : f32 to vector<2x256xf32>
    %449 = arith.mulf %446, %448 : vector<2x256xf32>
    %450 = arith.addf %445, %449 : vector<2x256xf32>
    %c0_190 = arith.constant 0 : index
    %c69 = arith.constant 69 : index
    %451 = vector.load %arg7[%c0_190, %c69] : memref<2x358xf32, #tpu.memory_space<vmem>>, vector<2x256xf32>
    %c33_191 = arith.constant 33 : index
    %452 = memref.load %arg4[%c33_191] : memref<98xf32, #tpu.memory_space<smem>>
    %453 = vector.broadcast %452 : f32 to vector<2x256xf32>
    %454 = arith.mulf %451, %453 : vector<2x256xf32>
    %455 = arith.addf %450, %454 : vector<2x256xf32>
    %c0_192 = arith.constant 0 : index
    %c69_193 = arith.constant 69 : index
    %456 = vector.load %arg8[%c0_192, %c69_193] : memref<2x358xf32, #tpu.memory_space<vmem>>, vector<2x256xf32>
    %c82_194 = arith.constant 82 : index
    %457 = memref.load %arg4[%c82_194] : memref<98xf32, #tpu.memory_space<smem>>
    %458 = vector.broadcast %457 : f32 to vector<2x256xf32>
    %459 = arith.mulf %456, %458 : vector<2x256xf32>
    %460 = arith.addf %455, %459 : vector<2x256xf32>
    %c0_195 = arith.constant 0 : index
    %c85_196 = arith.constant 85 : index
    %461 = vector.load %arg7[%c0_195, %c85_196] : memref<2x358xf32, #tpu.memory_space<vmem>>, vector<2x256xf32>
    %c40 = arith.constant 40 : index
    %462 = memref.load %arg4[%c40] : memref<98xf32, #tpu.memory_space<smem>>
    %463 = vector.broadcast %462 : f32 to vector<2x256xf32>
    %464 = arith.mulf %461, %463 : vector<2x256xf32>
    %465 = arith.addf %460, %464 : vector<2x256xf32>
    %c0_197 = arith.constant 0 : index
    %c85_198 = arith.constant 85 : index
    %466 = vector.load %arg8[%c0_197, %c85_198] : memref<2x358xf32, #tpu.memory_space<vmem>>, vector<2x256xf32>
    %c89 = arith.constant 89 : index
    %467 = memref.load %arg4[%c89] : memref<98xf32, #tpu.memory_space<smem>>
    %468 = vector.broadcast %467 : f32 to vector<2x256xf32>
    %469 = arith.mulf %466, %468 : vector<2x256xf32>
    %470 = arith.addf %465, %469 : vector<2x256xf32>
    %c0_199 = arith.constant 0 : index
    %c101 = arith.constant 101 : index
    %471 = vector.load %arg7[%c0_199, %c101] : memref<2x358xf32, #tpu.memory_space<vmem>>, vector<2x256xf32>
    %c47 = arith.constant 47 : index
    %472 = memref.load %arg4[%c47] : memref<98xf32, #tpu.memory_space<smem>>
    %473 = vector.broadcast %472 : f32 to vector<2x256xf32>
    %474 = arith.mulf %471, %473 : vector<2x256xf32>
    %475 = arith.addf %470, %474 : vector<2x256xf32>
    %c0_200 = arith.constant 0 : index
    %c101_201 = arith.constant 101 : index
    %476 = vector.load %arg8[%c0_200, %c101_201] : memref<2x358xf32, #tpu.memory_space<vmem>>, vector<2x256xf32>
    %c96_202 = arith.constant 96 : index
    %477 = memref.load %arg4[%c96_202] : memref<98xf32, #tpu.memory_space<smem>>
    %478 = vector.broadcast %477 : f32 to vector<2x256xf32>
    %479 = arith.mulf %476, %478 : vector<2x256xf32>
    %480 = arith.addf %475, %479 : vector<2x256xf32>
    %c5_203 = arith.constant 5 : index
    %c0_204 = arith.constant 0 : index
    %481 = vector.load %arg5[%c5_203, %c0_204] : memref<7x256xf32, #tpu.memory_space<vmem>>, vector<1x256xf32>
    %482 = vector.broadcast %481 : vector<1x256xf32> to vector<2x256xf32>
    %483 = arith.mulf %480, %482 : vector<2x256xf32>
    %484 = arith.addf %409, %483 : vector<2x256xf32>
    %cst_205 = arith.constant 0.000000e+00 : f32
    %485 = vector.broadcast %cst_205 : f32 to vector<2x256xf32>
    %c0_206 = arith.constant 0 : index
    %c6 = arith.constant 6 : index
    %486 = vector.load %arg7[%c0_206, %c6] : memref<2x358xf32, #tpu.memory_space<vmem>>, vector<2x256xf32>
    %c6_207 = arith.constant 6 : index
    %487 = memref.load %arg4[%c6_207] : memref<98xf32, #tpu.memory_space<smem>>
    %488 = vector.broadcast %487 : f32 to vector<2x256xf32>
    %489 = arith.mulf %486, %488 : vector<2x256xf32>
    %490 = arith.addf %485, %489 : vector<2x256xf32>
    %c0_208 = arith.constant 0 : index
    %c6_209 = arith.constant 6 : index
    %491 = vector.load %arg8[%c0_208, %c6_209] : memref<2x358xf32, #tpu.memory_space<vmem>>, vector<2x256xf32>
    %c55 = arith.constant 55 : index
    %492 = memref.load %arg4[%c55] : memref<98xf32, #tpu.memory_space<smem>>
    %493 = vector.broadcast %492 : f32 to vector<2x256xf32>
    %494 = arith.mulf %491, %493 : vector<2x256xf32>
    %495 = arith.addf %490, %494 : vector<2x256xf32>
    %c0_210 = arith.constant 0 : index
    %c22_211 = arith.constant 22 : index
    %496 = vector.load %arg7[%c0_210, %c22_211] : memref<2x358xf32, #tpu.memory_space<vmem>>, vector<2x256xf32>
    %c13 = arith.constant 13 : index
    %497 = memref.load %arg4[%c13] : memref<98xf32, #tpu.memory_space<smem>>
    %498 = vector.broadcast %497 : f32 to vector<2x256xf32>
    %499 = arith.mulf %496, %498 : vector<2x256xf32>
    %500 = arith.addf %495, %499 : vector<2x256xf32>
    %c0_212 = arith.constant 0 : index
    %c22_213 = arith.constant 22 : index
    %501 = vector.load %arg8[%c0_212, %c22_213] : memref<2x358xf32, #tpu.memory_space<vmem>>, vector<2x256xf32>
    %c62 = arith.constant 62 : index
    %502 = memref.load %arg4[%c62] : memref<98xf32, #tpu.memory_space<smem>>
    %503 = vector.broadcast %502 : f32 to vector<2x256xf32>
    %504 = arith.mulf %501, %503 : vector<2x256xf32>
    %505 = arith.addf %500, %504 : vector<2x256xf32>
    %c0_214 = arith.constant 0 : index
    %c38_215 = arith.constant 38 : index
    %506 = vector.load %arg7[%c0_214, %c38_215] : memref<2x358xf32, #tpu.memory_space<vmem>>, vector<2x256xf32>
    %c20_216 = arith.constant 20 : index
    %507 = memref.load %arg4[%c20_216] : memref<98xf32, #tpu.memory_space<smem>>
    %508 = vector.broadcast %507 : f32 to vector<2x256xf32>
    %509 = arith.mulf %506, %508 : vector<2x256xf32>
    %510 = arith.addf %505, %509 : vector<2x256xf32>
    %c0_217 = arith.constant 0 : index
    %c38_218 = arith.constant 38 : index
    %511 = vector.load %arg8[%c0_217, %c38_218] : memref<2x358xf32, #tpu.memory_space<vmem>>, vector<2x256xf32>
    %c69_219 = arith.constant 69 : index
    %512 = memref.load %arg4[%c69_219] : memref<98xf32, #tpu.memory_space<smem>>
    %513 = vector.broadcast %512 : f32 to vector<2x256xf32>
    %514 = arith.mulf %511, %513 : vector<2x256xf32>
    %515 = arith.addf %510, %514 : vector<2x256xf32>
    %c0_220 = arith.constant 0 : index
    %c54_221 = arith.constant 54 : index
    %516 = vector.load %arg7[%c0_220, %c54_221] : memref<2x358xf32, #tpu.memory_space<vmem>>, vector<2x256xf32>
    %c27 = arith.constant 27 : index
    %517 = memref.load %arg4[%c27] : memref<98xf32, #tpu.memory_space<smem>>
    %518 = vector.broadcast %517 : f32 to vector<2x256xf32>
    %519 = arith.mulf %516, %518 : vector<2x256xf32>
    %520 = arith.addf %515, %519 : vector<2x256xf32>
    %c0_222 = arith.constant 0 : index
    %c54_223 = arith.constant 54 : index
    %521 = vector.load %arg8[%c0_222, %c54_223] : memref<2x358xf32, #tpu.memory_space<vmem>>, vector<2x256xf32>
    %c76 = arith.constant 76 : index
    %522 = memref.load %arg4[%c76] : memref<98xf32, #tpu.memory_space<smem>>
    %523 = vector.broadcast %522 : f32 to vector<2x256xf32>
    %524 = arith.mulf %521, %523 : vector<2x256xf32>
    %525 = arith.addf %520, %524 : vector<2x256xf32>
    %c0_224 = arith.constant 0 : index
    %c70_225 = arith.constant 70 : index
    %526 = vector.load %arg7[%c0_224, %c70_225] : memref<2x358xf32, #tpu.memory_space<vmem>>, vector<2x256xf32>
    %c34_226 = arith.constant 34 : index
    %527 = memref.load %arg4[%c34_226] : memref<98xf32, #tpu.memory_space<smem>>
    %528 = vector.broadcast %527 : f32 to vector<2x256xf32>
    %529 = arith.mulf %526, %528 : vector<2x256xf32>
    %530 = arith.addf %525, %529 : vector<2x256xf32>
    %c0_227 = arith.constant 0 : index
    %c70_228 = arith.constant 70 : index
    %531 = vector.load %arg8[%c0_227, %c70_228] : memref<2x358xf32, #tpu.memory_space<vmem>>, vector<2x256xf32>
    %c83_229 = arith.constant 83 : index
    %532 = memref.load %arg4[%c83_229] : memref<98xf32, #tpu.memory_space<smem>>
    %533 = vector.broadcast %532 : f32 to vector<2x256xf32>
    %534 = arith.mulf %531, %533 : vector<2x256xf32>
    %535 = arith.addf %530, %534 : vector<2x256xf32>
    %c0_230 = arith.constant 0 : index
    %c86_231 = arith.constant 86 : index
    %536 = vector.load %arg7[%c0_230, %c86_231] : memref<2x358xf32, #tpu.memory_space<vmem>>, vector<2x256xf32>
    %c41 = arith.constant 41 : index
    %537 = memref.load %arg4[%c41] : memref<98xf32, #tpu.memory_space<smem>>
    %538 = vector.broadcast %537 : f32 to vector<2x256xf32>
    %539 = arith.mulf %536, %538 : vector<2x256xf32>
    %540 = arith.addf %535, %539 : vector<2x256xf32>
    %c0_232 = arith.constant 0 : index
    %c86_233 = arith.constant 86 : index
    %541 = vector.load %arg8[%c0_232, %c86_233] : memref<2x358xf32, #tpu.memory_space<vmem>>, vector<2x256xf32>
    %c90 = arith.constant 90 : index
    %542 = memref.load %arg4[%c90] : memref<98xf32, #tpu.memory_space<smem>>
    %543 = vector.broadcast %542 : f32 to vector<2x256xf32>
    %544 = arith.mulf %541, %543 : vector<2x256xf32>
    %545 = arith.addf %540, %544 : vector<2x256xf32>
    %c0_234 = arith.constant 0 : index
    %c102 = arith.constant 102 : index
    %546 = vector.load %arg7[%c0_234, %c102] : memref<2x358xf32, #tpu.memory_space<vmem>>, vector<2x256xf32>
    %c48_235 = arith.constant 48 : index
    %547 = memref.load %arg4[%c48_235] : memref<98xf32, #tpu.memory_space<smem>>
    %548 = vector.broadcast %547 : f32 to vector<2x256xf32>
    %549 = arith.mulf %546, %548 : vector<2x256xf32>
    %550 = arith.addf %545, %549 : vector<2x256xf32>
    %c0_236 = arith.constant 0 : index
    %c102_237 = arith.constant 102 : index
    %551 = vector.load %arg8[%c0_236, %c102_237] : memref<2x358xf32, #tpu.memory_space<vmem>>, vector<2x256xf32>
    %c97_238 = arith.constant 97 : index
    %552 = memref.load %arg4[%c97_238] : memref<98xf32, #tpu.memory_space<smem>>
    %553 = vector.broadcast %552 : f32 to vector<2x256xf32>
    %554 = arith.mulf %551, %553 : vector<2x256xf32>
    %555 = arith.addf %550, %554 : vector<2x256xf32>
    %c6_239 = arith.constant 6 : index
    %c0_240 = arith.constant 0 : index
    %556 = vector.load %arg5[%c6_239, %c0_240] : memref<7x256xf32, #tpu.memory_space<vmem>>, vector<1x256xf32>
    %557 = vector.broadcast %556 : vector<1x256xf32> to vector<2x256xf32>
    %558 = arith.mulf %555, %557 : vector<2x256xf32>
    %559 = arith.addf %484, %558 : vector<2x256xf32>
    %560 = arith.negf %559 : vector<2x256xf32>
    %561 = math.exp %560 : vector<2x256xf32>
    %cst_241 = arith.constant 1.000000e+00 : f32
    %562 = vector.broadcast %cst_241 : f32 to vector<2x256xf32>
    %563 = arith.addf %562, %561 : vector<2x256xf32>
    %564 = arith.divf %562, %563 : vector<2x256xf32>
    %565 = vector.shape_cast %564 : vector<2x256xf32> to vector<2x1x256xf32>
    %566 = vector.broadcast %565 : vector<2x1x256xf32> to vector<2x32x256xf32>
    %567 = arith.mulf %22, %566 : vector<2x32x256xf32>
    %c0_242 = arith.constant 0 : index
    %c0_243 = arith.constant 0 : index
    %c0_244 = arith.constant 0 : index
    %568 = vector.load %arg6[%c0_242, %c0_243, %c0_244] : memref<2x32x256xf32, #tpu.memory_space<vmem>>, vector<2x32x256xf32>
    tpu.vector_store %arg6[%c0_242, %c0_243, %c0_244], %567 {strides = array<i32>} : memref<2x32x256xf32, #tpu.memory_space<vmem>>, vector<2x32x256xf32>,
    return
  }
  func.func @transform_0(%arg0: i32) -> (i32, i32, i32) {
    %c0_i32 = arith.constant 0 : i32
    %c0_i32_0 = arith.constant 0 : i32
    %c0_i32_1 = arith.constant 0 : i32
    return %arg0, %c0_i32, %c0_i32_0 : i32, i32, i32
  }
  func.func @transform_1(%arg0: i32) -> (i32, i32) {
    %c0_i32 = arith.constant 0 : i32
    %c0_i32_0 = arith.constant 0 : i32
    %c0_i32_1 = arith.constant 0 : i32
    return %c0_i32, %c0_i32_0 : i32, i32
  }
  func.func @transform_2(%arg0: i32) -> (i32, i32) {
    %c0_i32 = arith.constant 0 : i32
    %c0_i32_0 = arith.constant 0 : i32
    %c0_i32_1 = arith.constant 0 : i32
    return %c0_i32, %c0_i32_0 : i32, i32
  }
  func.func @transform_3(%arg0: i32) -> i32 {
    %c0_i32 = arith.constant 0 : i32
    %c0_i32_0 = arith.constant 0 : i32
    return %c0_i32 : i32
  }
  func.func @transform_4(%arg0: i32) -> (i32, i32) {
    %c0_i32 = arith.constant 0 : i32
    %c0_i32_0 = arith.constant 0 : i32
    %c0_i32_1 = arith.constant 0 : i32
    return %c0_i32, %c0_i32_0 : i32, i32
  }
  func.func @transform_5(%arg0: i32) -> (i32, i32, i32) {
    %c0_i32 = arith.constant 0 : i32
    %c0_i32_0 = arith.constant 0 : i32
    %c0_i32_1 = arith.constant 0 : i32
    return %arg0, %c0_i32, %c0_i32_0 : i32, i32, i32
  }
}

</mosaic_0001>

<bundles_post_ra>
// kernel: tpu_custom_call.1
= control target key start
LH: loop header
LB: loop body
LE: loop exit
PB: predicated region body
PF: predicated region fallthrough
CT: control target
= control target key end

     0   :  { %10 = vsyncpa [#allocation5], 0  ;;  %s2975_s0 = inlined_call_operand.hbm [shape: f32[2,32,256], index: 0, kind: input, shape index: {}]   ;;  %s2976_s1 = inlined_call_operand.vmem [shape: f32[32,2], index: 1, kind: input, shape index: {}]   ;;  %s2977_s2 = inlined_call_operand.vmem [shape: f32[2,32], index: 2, kind: input, shape index: {}]   ;;  %s2978_s3 = inlined_call_operand.vmem [shape: f32[98], index: 3, kind: input, shape index: {}]   ;;  %s2979_s4 = inlined_call_operand.vmem [shape: f32[7,256], index: 4, kind: input, shape index: {}]   ;;  %s2980_s5 = inlined_call_operand.hbm [shape: f32[2,32,256], index: 5, kind: output, shape index: {}]  }
   0x1   :  { %11 = vsyncpa [#allocation7], 0 }
   0x2   :  { %12 = vsyncpa [#allocation6], 0  ;;  %s2071_s18 = smov [#allocation4]   ;;  %s35_s22 = sshll.u32 %s2978_s3, 4  ;;  %s36_s22 = int_to_ptr.vmem [resolvable:$true] %s35_s22 }
   0x3   :  { %s18_s19 = sshll.u32 %s2071_s18, 4  ;;  %s2009_s25 = scalar_lea.hbm %s2975_s0, 2048  ;;  %s19_s19 = int_to_ptr.vmem [resolvable:$true] %s18_s19 }
   0x4   :  { %p2010_p0 = scmp.ne.s32.totalorder %s2975_s0, %s2009_s25  ;;  %p2013_p1 = scmp.lt.u32.totalorder %s2009_s25, %s2975_s0 }
   0x6   :  { %p2015_p2 = pnand %p2013_p1, %p2010_p0 }
   0x8   :  { %2018 = shalt.err (!%p2015_p2)
}
   0x9   :  { %s2019_s30 = scalar_lea.vmem %s19_s19, 2048  ;;  %p2024_p4 = scmp.lt.s32.totalorder %s19_s19, %s19_s19 }
   0xa   :  { %p2020_p3 = scmp.ne.s32.totalorder %s19_s19, %s2019_s30  ;;  %p2025_p5 = scmp.lt.s32.totalorder %s2019_s30, %s2019_s30 }
   0xc   :  { %p2026_p6 = por %p2025_p5, %p2024_p4 }
   0xe   :  { %p2027_p7 = pnand %p2026_p6, %p2020_p3 }
  0x10   :  { %2030 = shalt.err (!%p2027_p7)
}
  0x11   :  { %s2072_s3 = smov 256   ;;  %s2073_s6 = smov 16  }
  0x12   :  { %24 = dma.hbm_to_vmem [thread:$0]  %s2975_s0, 2048, %s19_s19, [#allocation5], %s2072_s3, %s2072_s3, %s2073_s6  }
  0x13   :  { %s2031_s9 = scalar_lea.vmem %s36_s22, 16  ;;  %p2036_p9 = scmp.lt.s32.totalorder %s36_s22, %s36_s22 }
  0x14   :  { %p2032_p8 = scmp.ne.s32.totalorder %s36_s22, %s2031_s9  ;;  %p2037_p10 = scmp.lt.s32.totalorder %s2031_s9, %s2031_s9 }
  0x16   :  { %p2038_p11 = por %p2037_p10, %p2036_p9 }
  0x18   :  { %p2039_p12 = pnand %p2038_p11, %p2032_p8 }
  0x1a   :  { %2042 = shalt.err (!%p2039_p12)
}
  0x1b   :  { %s2074_s10 = smov [#allocation8]  }
  0x1c   :  { %38 = dma.vmem_to_smem %s36_s22, 16, %s2074_s10, [#allocation7]  }
  0x1d   :  { %2065 = dma.done.wait [#allocation5], 2048  }
  0x1e   :  { %2066 = vsyncadd [#allocation5], 4294965248 }
  0x1f   :  { %2067 = dma.done.wait [#allocation7], 16  }
  0x20   :  { %2068 = vsyncadd [#allocation7], 4294967280 }
  0x21   :  { %47 = sfence }
  0x22   :  { %v2148_v0 = vld [vmem:[#allocation4 + $0x40] sm:$0xff]  ;;  %v2150_v1 = vld [vmem:[#allocation4 + $0x48] sm:$0xff]  ;;  %v2158_v5 = vld [vmem:[#allocation4 + $0x50] sm:$0xff]  ;;  %v2075_v35 = vmov 0.0|0.0   ;;  %vm2076_vm0 = vmmov 0   ;;  %v2077_v39 = vmov 0.0   ;;  %v129_v45 = vlaneseq }
  0x23   :  { %v2152_v2 = vld [vmem:[#allocation4] sm:$0xff]  ;;  %v76_v3 = vadd.f32 %v2150_v1, %v2148_v0  ;;  %v2156_v4 = vld [vmem:[#allocation4 + $0x8] sm:$0xff]  ;;  %v2160_v6 = vld [vmem:[#allocation4 + $0x58] sm:$0xff]  ;;  %v109_v27 = vmax.f32 %v2148_v0, %v2150_v1  ;;  %1966 = vmatprep.subr.bf16.mxu0 %v2075_v35  ;;  %1958 = vmatprep.mubr.msk.f32.mxu0 %vm2076_vm0, %v2077_v39  ;;  %vm140_vm1 = vcmask 130112   ;;  %vm147_vm2 = vcmask 195712   ;;  %s2079_s26 = smov 1  }
  0x24   :  { %v64_v7 = vadd.f32 %v2156_v4, %v2152_v2  ;;  %v2164_v8 = vld [vmem:[#allocation4 + $0x10] sm:$0xff]  ;;  %v2166_v9 = vld [vmem:[#allocation4 + $0x18] sm:$0xff]  ;;  %v79_v10 = vadd.f32 %v2160_v6, %v2158_v5  ;;  %v2172_v12 = vld [vmem:[#allocation4 + $0x60] sm:$0xff]  ;;  %v97_v25 = vmax.f32 %v2152_v2, %v2156_v4  ;;  %v112_v26 = vmax.f32 %v2158_v5, %v2160_v6  ;;  %1961 = vmatprep.subr.mxu1 %v2077_v39  ;;  %s2080_s27 = smov 3   ;;  %s2081_s28 = smov 2  }
  0x25   :  { %77 = vadd.xlane.f32.xlu1 %v76_v3  ;;  %v67_v11 = vadd.f32 %v2166_v9, %v2164_v8  ;;  %v2174_v13 = vld [vmem:[#allocation4 + $0x68] sm:$0xff]  ;;  %v2176_v14 = vld [vmem:[#allocation4 + $0x20] sm:$0xff]  ;;  %v2184_v18 = vld [vmem:[#allocation4 + $0x70] sm:$0xff]  ;;  %v100_v24 = vmax.f32 %v2164_v8, %v2166_v9  ;;  %1963 = vmatprep.mubr.msk.f32.mxu1 %vm2076_vm0, %v2077_v39  ;;  %v130_v48 = vand.u32 127, %v129_v45  ;;  %v2227_v50 = vshrl.u32 %v129_v45, 7  ;;  %s2082_s29 = smov 4  }
  0x26   :  { %65 = vadd.xlane.f32.xlu0 %v64_v7  ;;  %v2178_v15 = vld [vmem:[#allocation4 + $0x28] sm:$0xff]  ;;  %v82_v16 = vadd.f32 %v2174_v13, %v2172_v12  ;;  %v2186_v19 = vld [vmem:[#allocation4 + $0x78] sm:$0xff]  ;;  %v2188_v20 = vld [vmem:[#allocation4 + $0x30] sm:$0xff]  ;;  %v115_v28 = vmax.f32 %v2172_v12, %v2174_v13  ;;  %vm154_vm3 = vcmask 261312   ;;  %vm175_vm4 = vcmask 1041409   ;;  %s2083_s30 = smov 51  }
  0x27   :  { %v70_v17 = vadd.f32 %v2178_v15, %v2176_v14  ;;  %v2190_v21 = vld [vmem:[#allocation4 + $0x38] sm:$0xff]  ;;  %v85_v22 = vadd.f32 %v2186_v19, %v2184_v18  ;;  %v103_v29 = vmax.f32 %v2176_v14, %v2178_v15  ;;  %v118_v30 = vmax.f32 %v2184_v18, %v2186_v19  ;;  %v231_v36 = vld [vmem:[%s2976_s1 + $0x10] sm:$0xff]  ;;  %v232_v37 = vld [vmem:[%s2976_s1 + $0x18] sm:$0xff]  ;;  %2999 = vst [vmem:[#allocation13_spill] sm:$0xff] %v2227_v50  ;;  %s1870_s7 = sld [smem:[#allocation8 + $0x3a]]  ;;  %s1855_s8 = sld [smem:[#allocation8 + $0x39]] }
  0x28   :  { %v73_v23 = vadd.f32 %v2190_v21, %v2188_v20  ;;  %v106_v31 = vmax.f32 %v2188_v20, %v2190_v21  ;;  %v229_v32 = vld [vmem:[%s2976_s1] sm:$0xff]  ;;  %v230_v33 = vld [vmem:[%s2976_s1 + $0x8] sm:$0xff]  ;;  %v1970_v38 = vpack.c.bf16 %v232_v37, %v231_v36  ;;  %v135_v51 = vadd.s32 4294967288, %v130_v48  ;;  %s1857_s9 = sld [smem:[#allocation8 + $0x40]]  ;;  %s1872_s10 = sld [smem:[#allocation8 + $0x41]] }
  0x29   :  { %80 = vadd.xlane.f32.xlu1 %v79_v10  ;;  %v1967_v34 = vpack.c.bf16 %v230_v33, %v229_v32  ;;  %v142_v52 = vadd.s32 4294967280, %v130_v48  ;;  %v149_v54 = vadd.s32 4294967272, %v130_v48  ;;  %v133_v56 = vsub.s32 %v130_v48, %v2227_v50  ;;  %s1885_s0 = sld [smem:[#allocation8 + $0x3b]]  ;;  %s1900_s11 = sld [smem:[#allocation8 + $0x3c]] }
  0x2a   :  { %68 = vadd.xlane.f32.xlu0 %v67_v11  ;;  %v138_v57 = vsub.s32 %v135_v51, %v2227_v50  ;;  %vm224_vm5 = vcmask 1043459   ;;  %vm227_vm6 = vcmask 1041408   ;;  %vm233_vm7 = vcmask 261120   ;;  %s2393_s12 = sld [smem:[#allocation8 + $0x48]]  ;;  %s2395_s13 = sld [smem:[#allocation8 + $0x47]] }
  0x2b   :  { %1968 = vmatpush3.bf16.msra.mxu0 %v1967_v34  ;;  %v145_v59 = vsub.s32 %v142_v52, %v2227_v50  ;;  %v152_v10 = vsub.s32 %v149_v54, %v2227_v50  ;;  %vm309_vm8 = vcmask 15360   ;;  %vm527_vm9 = vcmask 410624   ;;  %s2084_s14 = smov 112   ;;  %s2401_s15 = sld [smem:[#allocation8 + $0x43]] }
  0x2c   :  { %1969 = vmatprep.subr.bf16.mxu0 %v2075_v35  ;;  %vm529_vm10 = vcmask 828824   ;;  %574 = vst.msk [vmem:[#allocation3] sm:$0x3] %vm527_vm9, %v2077_v39  ;;  %528 = vst.msk [vmem:[#allocation2] sm:$0x3] %vm527_vm9, %v2077_v39  ;;  %vm558_vm11 = vcmask 1045509  }
  0x2d   :  { %83 = vadd.xlane.f32.xlu1 %v82_v16  ;;  %575 = vst.msk [vmem:[#allocation3 + $0x4] sm:$0x3] %vm529_vm10, %v2077_v39  ;;  %530 = vst.msk [vmem:[#allocation2 + $0x4] sm:$0x3] %vm529_vm10, %v2077_v39  ;;  %vm560_vm12 = vcmask 1047559   ;;  %vm568_vm13 = vcmask 1041816  }
  0x2e   :  { %71 = vadd.xlane.f32.xlu0 %v70_v17  ;;  %vm569_vm14 = vcmask 1043458   ;;  %vm571_vm0 = vcmask 414724   ;;  %s2407_s16 = sld [smem:[#allocation8 + $0x42]]  ;;  %s2085_s17 = smov 96   ;;  %vm712_vm9 = vcmask 392192   ;;  %vm919_vm10 = vcmask 7168  }
  0x2f   :  { %1971 = vmatpush3.bf16.msra.mxu0 %v1970_v38  ;;  %vm570_vm15 = vmor %vm569_vm14, %vm568_vm13  ;;  %s2411_s1 = sld [smem:[#allocation8 + $0x3e]]  ;;  %s2413_s18 = sld [smem:[#allocation8 + $0x3d]]  ;;  %vm1738_vm13 = vcmask 48128   ;;  %vm927_vm14 = vcmask 1039360  }
  0x30   :  { %s2419_s19 = sld [smem:[#allocation8 + $0x4e]]  ;;  %s2421_s20 = sld [smem:[#allocation8 + $0x4a]] }
  0x31   :  { %86 = vadd.xlane.f32.xlu1 %v85_v22  ;;  %s2425_s21 = sld [smem:[#allocation8 + $0x49]]  ;;  %s2431_s23 = sld [smem:[#allocation8 + $0x32]] }
  0x32   :  { %74 = vadd.xlane.f32.xlu0 %v73_v23  ;;  %s2429_s22 = sld [smem:[#allocation8 + $0x1]]  ;;  %s2433_s24 = sld [smem:[#allocation8 + $0x2]] }
  0x33   :  { %s2435_s25 = sld [smem:[#allocation8 + $0x33]] }
  0x35   :  { %101 = vmax.xlane.f32.xlu1 %v100_v24 }
  0x36   :  { %98 = vmax.xlane.f32.xlu0 %v97_v25 }
  0x39   :  { %113 = vmax.xlane.f32.xlu1 %v112_v26 }
  0x3a   :  { %110 = vmax.xlane.f32.xlu0 %v109_v27 }
  0x3d   :  { %116 = vmax.xlane.f32.xlu1 %v115_v28 }
  0x3e   :  { %104 = vmax.xlane.f32.xlu0 %v103_v29 }
  0x41   :  { %119 = vmax.xlane.f32.xlu1 %v118_v30 }
  0x42   :  { %107 = vmax.xlane.f32.xlu0 %v106_v31 }
  0xb2   :  { %v78_v40 = vpop.xlane.xlu1 %77 }
  0xb3   :  { %v66_v41 = vpop.xlane.xlu0 %65  ;;  %v93_v60 = vmul.f32 0.00390625, %v78_v40 }
  0xb4   :  { %v89_v61 = vmul.f32 0.00390625, %v66_v41 }
  0xb5   :  { %v159_v23 = vrot.slane %v93_v60, %v133_v56 }
  0xb6   :  { %v81_v42 = vpop.xlane.xlu1 %80  ;;  %v134_v24 = vrot.slane %v89_v61, %v133_v56 }
  0xb7   :  { %v69_v43 = vpop.xlane.xlu0 %68  ;;  %v94_v58 = vmul.f32 0.00390625, %v81_v42 }
  0xb8   :  { %v90_v62 = vmul.f32 0.00390625, %v69_v43 }
  0xb9   :  { %v163_v22 = vrot.slane %v94_v58, %v138_v57 }
  0xba   :  { %v84_v44 = vpop.xlane.xlu1 %83  ;;  %v139_v25 = vrot.slane %v90_v62, %v138_v57 }
  0xbb   :  { %v72_v46 = vpop.xlane.xlu0 %71  ;;  %v95_v63 = vmul.f32 0.00390625, %v84_v44  ;;  %v164_v37 = vsel %vm140_vm1, %v163_v22, %v159_v23  ;;  %v2253_v22 = vsub.s32 1, %v2227_v50 }
  0xbc   :  { %v91_v7 = vmul.f32 0.00390625, %v72_v46  ;;  %v141_v40 = vsel %vm140_vm1, %v139_v25, %v134_v24  ;;  %v2256_v24 = vsub.s32 0, %v2227_v50 }
  0xbd   :  { %v168_v26 = vrot.slane %v95_v63, %v145_v59 }
  0xbe   :  { %v87_v47 = vpop.xlane.xlu1 %86  ;;  %v146_v28 = vrot.slane %v91_v7, %v145_v59 }
  0xbf   :  { %v75_v49 = vpop.xlane.xlu0 %74  ;;  %v96_v11 = vmul.f32 0.00390625, %v87_v47  ;;  %v169_v41 = vsel %vm147_vm2, %v168_v26, %v164_v37 }
  0xc0   :  { %v92_v17 = vmul.f32 0.00390625, %v75_v49  ;;  %v148_v43 = vsel %vm147_vm2, %v146_v28, %v141_v40 }
  0xc1   :  { %v173_v29 = vrot.slane %v96_v11, %v152_v10 }
  0xc2   :  { %v102_v53 = vpop.xlane.xlu1 %101  ;;  %v153_v33 = vrot.slane %v92_v17, %v152_v10 }
  0xc3   :  { %v99_v55 = vpop.xlane.xlu0 %98  ;;  %v193_v34 = vrot.slane %v102_v53, %v138_v57  ;;  %v174_v47 = vsel %vm154_vm3, %v173_v29, %v169_v41 }
  0xc4   :  { %v189_v35 = vrot.slane %v99_v55, %v133_v56  ;;  %v155_v52 = vsel %vm154_vm3, %v153_v33, %v148_v43 }
  0xc6   :  { %v114_v3 = vpop.xlane.xlu1 %113  ;;  %v194_v48 = vsel %vm140_vm1, %v193_v34, %v189_v35  ;;  %v1896_v35 = vld [vmem:[%s2979_s4 + $0x3] ss:$8 sm:$0x3] }
  0xc7   :  { %v111_v16 = vpop.xlane.xlu0 %110  ;;  %v212_v30 = vrot.slane %v114_v3, %v138_v57  ;;  %v1234_v40 = vrot.slane %v1896_v35, %v2253_v22 }
  0xc8   :  { %v208_v31 = vrot.slane %v111_v16, %v133_v56  ;;  %v176_v56 = vsel %vm175_vm4, %v174_v47, %v155_v52 }
  0xca   :  { %v117_v27 = vpop.xlane.xlu1 %116  ;;  %v213_v44 = vsel %vm140_vm1, %v212_v30, %v208_v31  ;;  %v1866_v30 = vld [vmem:[%s2979_s4 + $0x1] ss:$8 sm:$0x3]  ;;  %vm565_vm1 = vcmask 416768  }
  0xcb   :  { %v105_v32 = vpop.xlane.xlu0 %104  ;;  %v217_v36 = vrot.slane %v117_v27, %v145_v59  ;;  %v2078_v27 = vmov 1983009808   ;;  %v903_v31 = vrot.slane %v1866_v30, %v2256_v24 }
  0xcc   :  { %v198_v38 = vrot.slane %v105_v32, %v145_v59  ;;  %v308_v59 = vld [vmem:[%s2977_s2] sm:$0x3]  ;;  %v537_v28 = vunpack.c.l.s4 %v2078_v27  ;;  %v907_v32 = vrot.slane %v1866_v30, %v2253_v22  ;;  %s2415_s2 = sld [smem:[#allocation8 + $0x4f]] }
  0xcd   :  { %v218_v49 = vsel %vm147_vm2, %v217_v36, %v213_v44  ;;  %1962 = vmatpush3.msk.msra.mxu1 %vm227_vm6, %v308_v59  ;;  %v1881_v36 = vld [vmem:[%s2979_s4 + $0x2] ss:$8 sm:$0x3] }
  0xce   :  { %v120_v42 = vpop.xlane.xlu1 %119  ;;  %v199_v53 = vsel %vm147_vm2, %v198_v38, %v194_v48  ;;  %v538_v29 = vunpack.c.0.s8 %v537_v28  ;;  %v908_v34 = vcombine.low %v903_v31, %v907_v32  ;;  %v1230_v38 = vrot.slane %v1896_v35, %v2256_v24  ;;  %vm572_vm2 = vmor %vm571_vm0, %vm570_vm15 }
  0xcf   :  { %v222_v45 = vrot.slane %v120_v42, %v152_v10  ;;  %v108_v46 = vpop.xlane.xlu0 %107  ;;  %v1067_v41 = vrot.slane %v1881_v36, %v2256_v24  ;;  %v1071_v42 = vrot.slane %v1881_v36, %v2253_v22  ;;  %vm1090_vm15 = vcmask 1031168  }
  0xd0   :  { %v203_v51 = vrot.slane %v108_v46, %v152_v10  ;;  %v2266_v33 = vsub.s32 %v538_v29, %v2227_v50  ;;  %v1235_v43 = vcombine.low %v1230_v38, %v1234_v40  ;;  %vm1254_vm0 = vcmask 1022976  }
  0xd1   :  { %v223_v54 = vsel %vm154_vm3, %v222_v45, %v218_v49  ;;  %v1072_v44 = vcombine.low %v1067_v41, %v1071_v42  ;;  %v1911_v45 = vld [vmem:[%s2979_s4 + $0x4] ss:$8 sm:$0x3] }
  0xd2   :  { %v204_v55 = vsel %vm154_vm3, %v203_v51, %v199_v53  ;;  %3000 = vst [vmem:[#allocation14_spill] sm:$0xff] %v2266_v33  ;;  %v915_v37 = vrot.slane %v908_v34, %v2266_v33  ;;  %v1242_v46 = vrot.slane %v1235_v43, %v2266_v33  ;;  %v1394_v47 = vrot.slane %v1911_v45, %v2256_v24 }
  0xd3   :  { %v225_v57 = vsel %vm224_vm5, %v223_v54, %v204_v55  ;;  %v1398_v48 = vrot.slane %v1911_v45, %v2253_v22  ;;  %v1079_v49 = vrot.slane %v1072_v44, %v2266_v33  ;;  %vm627_vm3 = vcmask 916480  }
  0xd4   :  { %v228_v58 = vsel %vm227_vm6, %v176_v56, %v225_v57  ;;  %vm691_vm6 = vcmask 523264  }
  0xd5   :  { %1959 = vmatmul.mubr.msk.f32.vlgmr.msra.gmra.mrb[0].mxu0 %vm233_vm7, %v228_v58  ;;  %v1399_v51 = vcombine.low %v1394_v47, %v1398_v48 }
  0xd7   :  { %v1406_v52 = vrot.slane %v1399_v51, %v2266_v33 }
 0x1a8   :  { %v303_v60 = vpop.f32.mrb[0].mxu0 }
 0x1a9   :  { %v307_v61 = vmax.f32 %v303_v60, 0.0  ;;  %v1960_v62 = vpop.f32.mrb[1].mxu0 }
 0x1ab   :  { %1964 = vmatmul.mubr.msk.f32.vlgmr.msra.gmra.mrb[0].mxu1 %vm309_vm8, %v307_v61 }
 0x27e   :  { %v382_v63 = vpop.f32.mrb[0].mxu1 }
 0x27f   :  { %v387_v3 = vrot.slane %v382_v63, 2  ;;  %v1965_v7 = vpop.f32.mrb[1].mxu1 }
 0x281   :  { %v389_v10 = vadd.f32 %v387_v3, %v382_v63 }
 0x283   :  { %v1838_v11 = vmul.f32 -1.442695, %v389_v10 }
 0x285   :  { %2001 = vpow2.f32 %v1838_v11 }
 0x28f   :  { %v2002_v16 = vpop.eup %2001 }
 0x290   :  { %v393_v17 = vadd.f32 1.0, %v2002_v16 }
 0x292   :  { %2003 = vrcp.f32 %v393_v17 }
 0x29c   :  { %v2004_v23 = vpop.eup %2003 }
 0x29d   :  { %v418_v25 = vrot.slane %v2004_v23, %v2253_v22  ;;  %v399_v26 = vrot.slane %v2004_v23, %v2256_v24 }
 0x29f   :  { %424 = vbcast.lane.b32.xlu1 %v418_v25, 264  ;;  %420 = vbcast.lane.b32.xlu0 %v418_v25, 256 }
 0x2a3   :  { %428 = vbcast.lane.b32.xlu0 %v418_v25, 272  ;;  %401 = vbcast.lane.b32.xlu1 %v399_v26, 256 }
 0x2a7   :  { %432 = vbcast.lane.b32.xlu0 %v418_v25, 280  ;;  %405 = vbcast.lane.b32.xlu1 %v399_v26, 264 }
 0x2ab   :  { %409 = vbcast.lane.b32.xlu1 %v399_v26, 272  ;;  %1243 = vrot.lane.b32.xlu0 %v1242_v46, %s2080_s27  ;;  %s2441_s27 = sld [smem:[#allocation8 + $0x34]] }
 0x2af   :  { %413 = vbcast.lane.b32.xlu1 %v399_v26, 280  ;;  %1407 = vrot.lane.b32.xlu0 %v1406_v52, %s2082_s29  ;;  %s2447_s29 = sld [smem:[#allocation8 + $0x36]] }
 0x2b3   :  { %916 = vrot.lane.b32.xlu1 %v915_v37, %s2079_s26  ;;  %s2439_s26 = sld [smem:[#allocation8 + $0x3]] }
 0x2b7   :  { %1080 = vrot.lane.b32.xlu1 %v1079_v49, %s2081_s28  ;;  %s2445_s28 = sld [smem:[#allocation8 + $0x5]] }
 0x311   :  { %v425_v53 = vpop.permute.xlu1 %424  ;;  %v421_v54 = vpop.permute.xlu0 %420 }
 0x312   :  { %v2292_v55 = vmul.f32 %v425_v53, %v2158_v5  ;;  %v2295_v56 = vmul.f32 %v425_v53, %v2160_v6  ;;  %v2298_v57 = vmul.f32 %v421_v54, %v2148_v0  ;;  %v2301_v58 = vmul.f32 %v421_v54, %v2150_v1 }
 0x314   :  { %3001 = vst [vmem:[#allocation15_spill] sm:$0xff] %v2292_v55  ;;  %3002 = vst [vmem:[#allocation16_spill] sm:$0xff] %v2295_v56  ;;  %v468_v5 = vadd.f32 %v2292_v55, %v2298_v57  ;;  %v477_v6 = vadd.f32 %v2295_v56, %v2301_v58  ;;  %v509_v0 = vmax.f32 %v2298_v57, %v2292_v55 }
 0x315   :  { %3003 = vst [vmem:[#allocation17_spill] sm:$0xff] %v2298_v57  ;;  %3004 = vst [vmem:[#allocation18_spill] sm:$0xff] %v2301_v58  ;;  %v429_v59 = vpop.permute.xlu0 %428  ;;  %v402_v60 = vpop.permute.xlu1 %401  ;;  %v518_v1 = vmax.f32 %v2301_v58, %v2295_v56 }
 0x316   :  { %v2304_v61 = vmul.f32 %v429_v59, %v2172_v12  ;;  %v2307_v39 = vmul.f32 %v429_v59, %v2174_v13 }
 0x318   :  { %3005 = vst [vmem:[#allocation19_spill] sm:$0xff] %v2304_v61  ;;  %3006 = vst [vmem:[#allocation20_spill] sm:$0xff] %v2307_v39  ;;  %v469_v62 = vadd.f32 %v468_v5, %v2304_v61  ;;  %v478_v12 = vadd.f32 %v477_v6, %v2307_v39  ;;  %v510_v13 = vmax.f32 %v509_v0, %v2304_v61 }
 0x319   :  { %v433_v63 = vpop.permute.xlu0 %432  ;;  %v406_v3 = vpop.permute.xlu1 %405  ;;  %v519_v7 = vmax.f32 %v518_v1, %v2307_v39 }
 0x31a   :  { %v2322_v10 = vmul.f32 %v433_v63, %v2184_v18  ;;  %v2325_v11 = vmul.f32 %v433_v63, %v2186_v19  ;;  %v2328_v16 = vmul.f32 %v406_v3, %v2164_v8  ;;  %v2331_v17 = vmul.f32 %v406_v3, %v2166_v9 }
 0x31b   :  { %v2338_v18 = vmul.f32 %v402_v60, %v2152_v2  ;;  %v2341_v19 = vmul.f32 %v402_v60, %v2156_v4 }
 0x31c   :  { %3007 = vst [vmem:[#allocation21_spill] sm:$0xff] %v2322_v10  ;;  %3008 = vst [vmem:[#allocation22_spill] sm:$0xff] %v2325_v11  ;;  %v470_v23 = vadd.f32 %v469_v62, %v2322_v10  ;;  %v479_v25 = vadd.f32 %v478_v12, %v2325_v11  ;;  %v511_v26 = vmax.f32 %v510_v13, %v2322_v10 }
 0x31d   :  { %3009 = vst [vmem:[#allocation23_spill] sm:$0xff] %v2328_v16  ;;  %3010 = vst [vmem:[#allocation24_spill] sm:$0xff] %v2331_v17  ;;  %v520_v27 = vmax.f32 %v519_v7, %v2325_v11  ;;  %v410_v28 = vpop.permute.xlu1 %409  ;;  %v450_v31 = vadd.f32 %v2328_v16, %v2338_v18  ;;  %v459_v32 = vadd.f32 %v2331_v17, %v2341_v19 }
 0x31e   :  { %3011 = vst [vmem:[#allocation25_spill] sm:$0xff] %v2338_v18  ;;  %3012 = vst [vmem:[#allocation26_spill] sm:$0xff] %v2341_v19  ;;  %v471_v8 = vrot.slane %v470_v23, 4  ;;  %v480_v29 = vrot.slane %v479_v25, 4  ;;  %v512_v30 = vrot.slane %v511_v26, 4  ;;  %v2348_v34 = vmul.f32 %v410_v28, %v2176_v14 }
 0x31f   :  { %v521_v9 = vrot.slane %v520_v27, 4  ;;  %v2351_v2 = vmul.f32 %v410_v28, %v2178_v15  ;;  %v491_v38 = vmax.f32 %v2338_v18, %v2328_v16  ;;  %v500_v40 = vmax.f32 %v2341_v19, %v2331_v17 }
 0x320   :  { %3013 = vst [vmem:[#allocation27_spill] sm:$0xff] %v2348_v34  ;;  %v472_v35 = vadd.f32 %v471_v8, %v470_v23  ;;  %v481_v4 = vadd.f32 %v480_v29, %v479_v25  ;;  %v513_v36 = vmax.f32 %v511_v26, %v512_v30  ;;  %v451_v41 = vadd.f32 %v450_v31, %v2348_v34 }
 0x321   :  { %3014 = vst [vmem:[#allocation28_spill] sm:$0xff] %v2351_v2  ;;  %v522_v37 = vmax.f32 %v520_v27, %v521_v9  ;;  %v460_v42 = vadd.f32 %v459_v32, %v2351_v2  ;;  %v414_v43 = vpop.permute.xlu1 %413  ;;  %v492_v46 = vmax.f32 %v491_v38, %v2348_v34  ;;  %v501_v47 = vmax.f32 %v500_v40, %v2351_v2 }
 0x322   :  { %v473_v14 = vrot.slane %v472_v35, 2  ;;  %v482_v44 = vrot.slane %v481_v4, 2  ;;  %v514_v45 = vrot.slane %v513_v36, 2  ;;  %v2362_v48 = vmul.f32 %v414_v43, %v2188_v20 }
 0x323   :  { %v523_v15 = vrot.slane %v522_v37, 2  ;;  %v2365_v49 = vmul.f32 %v414_v43, %v2190_v21 }
 0x324   :  { %3015 = vst [vmem:[#allocation29_spill] sm:$0xff] %v2362_v48  ;;  %v474_v51 = vadd.f32 %v473_v14, %v472_v35  ;;  %v483_v52 = vadd.f32 %v482_v44, %v481_v4  ;;  %v515_v53 = vmax.f32 %v513_v36, %v514_v45  ;;  %v452_v59 = vadd.f32 %v451_v41, %v2362_v48 }
 0x325   :  { %3016 = vst [vmem:[#allocation30_spill] sm:$0xff] %v2365_v49  ;;  %v524_v54 = vmax.f32 %v522_v37, %v523_v15  ;;  %v461_v60 = vadd.f32 %v460_v42, %v2365_v49  ;;  %v493_v5 = vmax.f32 %v492_v46, %v2362_v48  ;;  %v502_v6 = vmax.f32 %v501_v47, %v2365_v49 }
 0x326   :  { %v475_v0 = vrot.slane %v474_v51, 1  ;;  %v484_v1 = vrot.slane %v483_v52, 1  ;;  %v516_v62 = vrot.slane %v515_v53, 1  ;;  %v453_v12 = vrot.slane %v452_v59, 4 }
 0x327   :  { %v525_v20 = vrot.slane %v524_v54, 1  ;;  %v462_v63 = vrot.slane %v461_v60, 4  ;;  %v494_v21 = vrot.slane %v493_v5, 4  ;;  %v503_v3 = vrot.slane %v502_v6, 4 }
 0x328   :  { %v476_v13 = vadd.f32 %v475_v0, %v474_v51  ;;  %v485_v7 = vadd.f32 %v484_v1, %v483_v52  ;;  %v517_v23 = vmax.f32 %v515_v53, %v516_v62  ;;  %v454_v26 = vadd.f32 %v453_v12, %v452_v59 }
 0x329   :  { %v526_v25 = vmax.f32 %v524_v54, %v525_v20  ;;  %v463_v27 = vadd.f32 %v462_v63, %v461_v60  ;;  %v495_v28 = vmax.f32 %v493_v5, %v494_v21  ;;  %v504_v8 = vmax.f32 %v502_v6, %v503_v3 }
 0x32a   :  { %v489_v29 = vmul.f32 0.03125, %v476_v13  ;;  %v490_v30 = vmul.f32 0.03125, %v485_v7  ;;  %v455_v9 = vrot.slane %v454_v26, 2 }
 0x32b   :  { %v464_v31 = vrot.slane %v463_v27, 2  ;;  %v496_v32 = vrot.slane %v495_v28, 2  ;;  %v505_v35 = vrot.slane %v504_v8, 2  ;;  %v588_v4 = vcombine.low %v517_v23, %v526_v25  ;;  %v2379_v23 = vpop.permute.xlu1 %916  ;;  %v2381_v25 = vpop.permute.xlu0 %1243 }
 0x32c   :  { %v456_v36 = vadd.f32 %v455_v9, %v454_v26  ;;  %v543_v41 = vcombine.low %v489_v29, %v490_v30 }
 0x32d   :  { %v465_v37 = vadd.f32 %v464_v31, %v463_v27  ;;  %v497_v38 = vmax.f32 %v495_v28, %v496_v32  ;;  %v506_v40 = vmax.f32 %v504_v8, %v505_v35  ;;  %v595_v45 = vrot.slane %v588_v4, %v2266_v33 }
 0x32e   :  { %v457_v42 = vrot.slane %v456_v36, 1  ;;  %v550_v59 = vrot.slane %v543_v41, %v2266_v33  ;;  %v952_v32 = vstv %s1870_s7  ;;  %v788_v35 = vstv %s1855_s8  ;;  %s2451_s7 = sld [smem:[#allocation8 + $0x4]]  ;;  %s2453_s8 = sld [smem:[#allocation8 + $0x35]] }
 0x32f   :  { %v466_v43 = vrot.slane %v465_v37, 1  ;;  %v498_v14 = vrot.slane %v497_v38, 1  ;;  %v507_v44 = vrot.slane %v506_v40, 1  ;;  %v598_v5 = vrot.slane %v595_v45, 7  ;;  %v2383_v26 = vpop.permute.xlu1 %1080  ;;  %v2385_v27 = vpop.permute.xlu0 %1407 }
 0x330   :  { %v458_v15 = vadd.f32 %v457_v42, %v456_v36  ;;  %v555_v62 = vrot.slane %v550_v59, 7  ;;  %v972_v41 = vstv %s1872_s10  ;;  %v1299_v59 = vstv %s2401_s15  ;;  %s2457_s10 = sld [smem:[#allocation8 + $0x37]]  ;;  %s2087_s15 = smov 64  }
 0x331   :  { %v467_v46 = vadd.f32 %v466_v43, %v465_v37  ;;  %v499_v47 = vmax.f32 %v497_v38, %v498_v14  ;;  %v508_v51 = vmax.f32 %v506_v40, %v507_v44  ;;  %v808_v40 = vstv %s1857_s9  ;;  %s2455_s9 = sld [smem:[#allocation8 + $0x6]] }
 0x332   :  { %v487_v52 = vmul.f32 0.03125, %v458_v15  ;;  %v1115_v44 = vstv %s1885_s0  ;;  %v1279_v15 = vstv %s1900_s11  ;;  %s2478_s0 = sld [smem:[#allocation8 + $0x45]]  ;;  %s2480_s11 = sld [smem:[#allocation8 + $0x44]] }
 0x333   :  { %v488_v53 = vmul.f32 0.03125, %v467_v46  ;;  %v580_v54 = vcombine.low %v499_v47, %v508_v51  ;;  %v992_v51 = vstv %s2393_s12  ;;  %s2508_s12 = sld [smem:[#allocation8 + $0x56]] }
 0x335   :  { %v587_v60 = vrot.slane %v580_v54, %v2266_v33  ;;  %v535_v6 = vcombine.low %v487_v52, %v488_v53  ;;  %v828_v52 = vstv %s2395_s13  ;;  %s2510_s13 = sld [smem:[#allocation8 + $0x55]] }
 0x337   :  { %v599_v0 = vsel %vm175_vm4, %v598_v5, %v587_v60  ;;  %v542_v1 = vrot.slane %v535_v6, %v2266_v33  ;;  %v1135_v60 = vstv %s2407_s16  ;;  %s1906_s16 = sld [smem:[#allocation8 + $0x51]] }
 0x338   :  { %v600_v20 = vsel %vm224_vm5, %v598_v5, %v599_v0 }
 0x339   :  { %v601_v12 = vsel %vm558_vm11, %v598_v5, %v600_v20  ;;  %v556_v63 = vsel %vm175_vm4, %v555_v62, %v542_v1  ;;  %v1607_v1 = vstv %s2411_s1  ;;  %v1443_v20 = vstv %s2413_s18  ;;  %s1891_s1 = sld [smem:[#allocation8 + $0x50]]  ;;  %s1934_s18 = sld [smem:[#allocation8 + $0x4c]] }
 0x33a   :  { %v602_v21 = vsel %vm560_vm12, %v598_v5, %v601_v12  ;;  %v557_v3 = vsel %vm224_vm5, %v555_v62, %v556_v63  ;;  %v1012_v12 = vstv %s2415_s2  ;;  %v848_v63 = vstv %s2419_s19  ;;  %s1919_s2 = sld [smem:[#allocation8 + $0x4b]]  ;;  %s1880_s19 = sld [smem:[#allocation8 + $0x5d]] }
 0x33b   :  { %603 = vrot.lane.b32.xlu1 %v602_v21, %s2083_s30  ;;  %v559_v13 = vsel %vm558_vm11, %v555_v62, %v557_v3  ;;  %v1319_v21 = vstv %s2421_s20  ;;  %v1155_v3 = vstv %s2425_s21  ;;  %s1865_s20 = sld [smem:[#allocation8 + $0x5c]]  ;;  %s2088_s21 = smov 48   ;;  %vm649_vm4 = vcmask 785408  }
 0x33c   :  { %v561_v7 = vsel %vm560_vm12, %v555_v62, %v559_v13  ;;  %v769_v13 = vstv %s2429_s22  ;;  %s1908_s22 = sld [smem:[#allocation8 + $0x58]]  ;;  %vm670_vm5 = vcmask 654336   ;;  %vm1246_vm11 = vcmask 23552  }
 0x33d   :  { %562 = vrot.lane.b32.xlu0 %v561_v7, %s2083_s30  ;;  %s2086_s30 = smov 80   ;;  %vm1574_vm12 = vcmask 39936  }
 0x3ad   :  { %v604_v28 = vpop.permute.xlu1 %603 }
 0x3ae   :  { %v605_v8 = vrot.slane %v604_v28, 6 }
 0x3af   :  { %v563_v29 = vpop.permute.xlu0 %562 }
 0x3b0   :  { %v606_v30 = vsel %vm565_vm1, %v605_v8, %v604_v28  ;;  %v564_v9 = vrot.slane %v563_v29, 6  ;;  %v774_v8 = vstv %s2431_s23  ;;  %s1893_s23 = sld [smem:[#allocation8 + $0x57]] }
 0x3b1   :  { %608 = vst.msk [vmem:[#allocation3] sm:$0x3f] %vm572_vm2, %v606_v30 }
 0x3b2   :  { %v566_v31 = vsel %vm565_vm1, %v564_v9, %v563_v29  ;;  %v933_v29 = vstv %s2433_s24  ;;  %v938_v9 = vstv %s2435_s25  ;;  %s1936_s24 = sld [smem:[#allocation8 + $0x53]]  ;;  %s1921_s25 = sld [smem:[#allocation8 + $0x52]]  ;;  %vm1418_vm1 = vcmask 1014784  }
 0x3b3   :  { %573 = vst.msk [vmem:[#allocation2] sm:$0x3f] %vm572_vm2, %v566_v31  ;;  %v1096_v31 = vstv %s2439_s26  ;;  %s1895_s26 = sld [smem:[#allocation8 + $0x5e]]  ;;  %vm1746_vm2 = vcmask 998400  }
 0x3b8   :  { %v2387_v4 = vld [vmem:[#allocation3] sm:$0x3f] }
 0x3b9   :  { %v2389_v36 = vld [vmem:[#allocation3] sm:$0x3f]  ;;  %v953_v37 = vmul.f32 %v952_v32, %v2387_v4  ;;  %v973_v43 = vmul.f32 %v972_v41, %v2387_v4  ;;  %v993_v53 = vmul.f32 %v992_v51, %v2387_v4  ;;  %v1101_v32 = vstv %s2441_s27  ;;  %s1910_s27 = sld [smem:[#allocation8 + $0x5f]] }
 0x3ba   :  { %v789_v38 = vmul.f32 %v788_v35, %v2389_v36  ;;  %v809_v42 = vmul.f32 %v808_v40, %v2389_v36  ;;  %v2403_v14 = vld [vmem:[#allocation3] sm:$0x3f]  ;;  %v829_v54 = vmul.f32 %v828_v52, %v2389_v36  ;;  %v2482_v30 = vld [vmem:[#allocation2] sm:$0x3f]  ;;  %v1424_v35 = vstv %s2445_s28  ;;  %s2089_s28 = smov 32  }
 0x3bb   :  { %955 = vrot.lane.b32.xlu0 %v953_v37, %s2084_s14  ;;  %v2405_v45 = vld [vmem:[#allocation3] sm:$0x3f]  ;;  %v1116_v46 = vmul.f32 %v1115_v44, %v2403_v14  ;;  %v1136_v6 = vmul.f32 %v1135_v60, %v2403_v14  ;;  %v2490_v37 = vld [vmem:[#allocation2] sm:$0x3f]  ;;  %v1429_v40 = vstv %s2447_s29  ;;  %v1260_v41 = vstv %s2451_s7  ;;  %s1923_s29 = sld [smem:[#allocation8 + $0x59]]  ;;  %s1938_s7 = sld [smem:[#allocation8 + $0x5a]] }
 0x3bc   :  { %791 = vrot.lane.b32.xlu1 %v789_v38, %s2084_s14  ;;  %v1280_v47 = vmul.f32 %v1279_v15, %v2405_v45  ;;  %v1300_v5 = vmul.f32 %v1299_v59, %v2405_v45  ;;  %v2461_v0 = vld [vmem:[#allocation3] sm:$0x3f]  ;;  %v2492_v38 = vld [vmem:[#allocation2] sm:$0x3f]  ;;  %v1265_v44 = vstv %s2453_s8  ;;  %v1588_v15 = vstv %s2455_s9  ;;  %s1854_s8 = sld [smem:[#allocation8 + $0x8]] }
 0x3bd   :  { %v2464_v62 = vld [vmem:[#allocation3] sm:$0x3f]  ;;  %v1608_v7 = vmul.f32 %v1607_v1, %v2461_v0  ;;  %v1320_v51 = vmul.f32 %v1319_v21, %v2405_v45  ;;  %v1156_v52 = vmul.f32 %v1155_v3, %v2403_v14  ;;  %v2512_v59 = vld [vmem:[#allocation2] sm:$0x3f]  ;;  %v775_v60 = vmul.f32 %v774_v8, %v2389_v36  ;;  %s1925_s9 = sld [smem:[#allocation8 + $0x60]] }
 0x3be   :  { %v1444_v28 = vmul.f32 %v1443_v20, %v2464_v62  ;;  %v1097_v1 = vmul.f32 %v1096_v31, %v2492_v38  ;;  %v1102_v20 = vmul.f32 %v1101_v32, %v2403_v14  ;;  %v1627_v31 = vstv %s2478_s0  ;;  %s1856_s0 = sld [smem:[#allocation8 + $0xf]] }
 0x3bf   :  { %811 = vrot.lane.b32.xlu0 %v809_v42, %s2085_s17  ;;  %v1013_v42 = vmul.f32 %v1012_v12, %v2387_v4  ;;  %v1463_v32 = vstv %s2480_s11  ;;  %s1858_s11 = sld [smem:[#allocation8 + $0x16]] }
 0x3c0   :  { %975 = vrot.lane.b32.xlu1 %v973_v43, %s2085_s17  ;;  %v2497_v43 = vld [vmem:[#allocation2] sm:$0x3f] }
 0x3c1   :  { %v1425_v12 = vmul.f32 %v1424_v35, %v2497_v43 }
 0x3c3   :  { %1118 = vrot.lane.b32.xlu0 %v1116_v46, %s2084_s14  ;;  %v1593_v46 = vstv %s2457_s10  ;;  %s1869_s10 = sld [smem:[#allocation8 + $0x9]] }
 0x3c4   :  { %1282 = vrot.lane.b32.xlu1 %v1280_v47, %s2084_s14  ;;  %v849_v47 = vmul.f32 %v848_v63, %v2389_v36  ;;  %v1430_v63 = vmul.f32 %v1429_v40, %v2464_v62 }
 0x3c6   :  { %v2531_v8 = vadd.f32 %v1430_v63, %v1425_v12  ;;  %v1052_v12 = vstv %s1880_s19  ;;  %v888_v63 = vstv %s1865_s20  ;;  %s1860_s19 = sld [smem:[#allocation8 + $0x1d]]  ;;  %s1901_s20 = sld [smem:[#allocation8 + $0x12]] }
 0x3c7   :  { %995 = vrot.lane.b32.xlu0 %v993_v53, %s2086_s30  ;;  %v2505_v53 = vld [vmem:[#allocation2] sm:$0x3f] }
 0x3c8   :  { %831 = vrot.lane.b32.xlu1 %v829_v54, %s2086_s30  ;;  %v770_v54 = vmul.f32 %v769_v13, %v2482_v30  ;;  %v1261_v13 = vmul.f32 %v1260_v41, %v2505_v53  ;;  %v1628_v41 = vmul.f32 %v1627_v31, %v2461_v0 }
 0x3ca   :  { %v2523_v21 = vadd.f32 %v775_v60, %v770_v54 }
 0x3cb   :  { %1302 = vrot.lane.b32.xlu0 %v1300_v5, %s2085_s17  ;;  %v934_v5 = vmul.f32 %v933_v29, %v2490_v37  ;;  %v1589_v29 = vmul.f32 %v1588_v15, %v2512_v59  ;;  %v868_v15 = vstv %s2510_s13  ;;  %s1886_s13 = sld [smem:[#allocation8 + $0x11]] }
 0x3cc   :  { %1138 = vrot.lane.b32.xlu1 %v1136_v6, %s2085_s17  ;;  %v939_v6 = vmul.f32 %v938_v9, %v2387_v4  ;;  %v1594_v9 = vmul.f32 %v1593_v46, %v2461_v0 }
 0x3ce   :  { %v2525_v3 = vadd.f32 %v939_v6, %v934_v5  ;;  %v2541_v40 = vadd.f32 %v1594_v9, %v1589_v29  ;;  %v1647_v5 = vstv %s1934_s18  ;;  %v1483_v6 = vstv %s1919_s2  ;;  %s1899_s18 = sld [smem:[#allocation8 + $0xb]]  ;;  %s1873_s2 = sld [smem:[#allocation8 + $0x17]] }
 0x3cf   :  { %1610 = vrot.lane.b32.xlu0 %v1608_v7, %s2084_s14  ;;  %v1266_v7 = vmul.f32 %v1265_v44, %v2405_v45  ;;  %v1032_v44 = vstv %s2508_s12  ;;  %v1359_v29 = vstv %s1908_s22  ;;  %v1195_v9 = vstv %s1893_s23  ;;  %s1884_s12 = sld [smem:[#allocation8 + $0xa]]  ;;  %s1888_s22 = sld [smem:[#allocation8 + $0x18]] }
 0x3d0   :  { %1446 = vrot.lane.b32.xlu1 %v1444_v28, %s2084_s14  ;;  %v2529_v28 = vadd.f32 %v1102_v20, %v1097_v1  ;;  %v1033_v46 = vmul.f32 %v1032_v44, %v2387_v4  ;;  %v1648_v1 = vmul.f32 %v1647_v5, %v2461_v0  ;;  %v1484_v20 = vmul.f32 %v1483_v6, %v2464_v62  ;;  %s1929_s23 = sld [smem:[#allocation8 + $0xd]] }
 0x3d1   :  { %v2537_v35 = vadd.f32 %v1266_v7, %v1261_v13  ;;  %v1053_v13 = vmul.f32 %v1052_v12, %v2387_v4  ;;  %v889_v7 = vmul.f32 %v888_v63, %v2389_v36  ;;  %v1360_v31 = vmul.f32 %v1359_v29, %v2405_v45 }
 0x3d2   :  { %v1215_v44 = vstv %s1895_s26  ;;  %v778_v5 = vstv %s1854_s8  ;;  %v1543_v6 = vstv %s1925_s9  ;;  %s1862_s26 = sld [smem:[#allocation8 + $0x24]]  ;;  %s1918_s8 = sld [smem:[#allocation8 + $0x1a]] }
 0x3d3   :  { %1015 = vrot.lane.b32.xlu0 %v1013_v42, %s2087_s15  ;;  %v1464_v42 = vmul.f32 %v1463_v32, %v2464_v62  ;;  %v1196_v32 = vmul.f32 %v1195_v9, %v2403_v14  ;;  %v1125_v9 = vstv %s1886_s13  ;;  %s1877_s9 = sld [smem:[#allocation8 + $0x25]]  ;;  %s1920_s13 = sld [smem:[#allocation8 + $0x21]] }
 0x3d4   :  { %851 = vrot.lane.b32.xlu1 %v849_v47, %s2087_s15  ;;  %v869_v47 = vmul.f32 %v868_v15, %v2389_v36  ;;  %v1379_v15 = vstv %s1910_s27  ;;  %s1903_s27 = sld [smem:[#allocation8 + $0x19]] }
 0x3d7   :  { %1322 = vrot.lane.b32.xlu0 %v1320_v51, %s2086_s30  ;;  %v1339_v51 = vstv %s1906_s16  ;;  %s1871_s16 = sld [smem:[#allocation8 + $0x10]] }
 0x3d8   :  { %1158 = vrot.lane.b32.xlu1 %v1156_v52, %s2086_s30  ;;  %v1175_v52 = vstv %s1891_s1  ;;  %v1340_v54 = vmul.f32 %v1339_v51, %v2405_v45  ;;  %v1523_v51 = vstv %s1923_s29  ;;  %s1914_s1 = sld [smem:[#allocation8 + $0xc]]  ;;  %s1890_s29 = sld [smem:[#allocation8 + $0x1f]] }
 0x3d9   :  { %v1176_v60 = vmul.f32 %v1175_v52, %v2403_v14  ;;  %v1687_v52 = vstv %s1938_s7  ;;  %s1931_s7 = sld [smem:[#allocation8 + $0x14]] }
 0x3db   :  { %1630 = vrot.lane.b32.xlu0 %v1628_v41, %s2085_s17  ;;  %v1667_v41 = vstv %s1936_s24  ;;  %s1916_s24 = sld [smem:[#allocation8 + $0x13]] }
 0x3dc   :  { %1466 = vrot.lane.b32.xlu1 %v1464_v42, %s2085_s17  ;;  %v1503_v42 = vstv %s1921_s25  ;;  %v1668_v4 = vmul.f32 %v1667_v41, %v2461_v0  ;;  %s1875_s25 = sld [smem:[#allocation8 + $0x1e]] }
 0x3dd   :  { %v1504_v36 = vmul.f32 %v1503_v42, %v2464_v62 }
 0x3de   :  { %v1433_v42 = vstv %s1914_s1  ;;  %s1894_s1 = sld [smem:[#allocation8 + $0x2d]] }
 0x3df   :  { %1035 = vrot.lane.b32.xlu0 %v1033_v46, %s2088_s21  ;;  %v1216_v46 = vmul.f32 %v1215_v44, %v2403_v14  ;;  %v779_v14 = vmul.f32 %v778_v5, %v2482_v30 }
 0x3e0   :  { %871 = vrot.lane.b32.xlu1 %v869_v47, %s2088_s21  ;;  %v1380_v47 = vmul.f32 %v1379_v15, %v2405_v45  ;;  %v1544_v45 = vmul.f32 %v1543_v6, %v2464_v62  ;;  %v982_v15 = vstv %s1873_s2  ;;  %v1597_v6 = vstv %s1929_s23  ;;  %s1922_s2 = sld [smem:[#allocation8 + $0x28]]  ;;  %s2653_s23 = sld [smem:[#allocation8 + $0x29]] }
 0x3e3   :  { %1342 = vrot.lane.b32.xlu0 %v1340_v54, %s2087_s15  ;;  %v1524_v54 = vmul.f32 %v1523_v51, %v2464_v62 }
 0x3e4   :  { %1178 = vrot.lane.b32.xlu1 %v1176_v60, %s2087_s15  ;;  %v1688_v60 = vmul.f32 %v1687_v52, %v2461_v0  ;;  %v1289_v52 = vstv %s1901_s20  ;;  %s1909_s20 = sld [smem:[#allocation8 + $0x2e]] }
 0x3e7   :  { %1650 = vrot.lane.b32.xlu0 %v1648_v1, %s2086_s30  ;;  %v942_v1 = vstv %s1869_s10  ;;  %s1864_s10 = sld [smem:[#allocation8 + $0x2b]] }
 0x3e8   :  { %1486 = vrot.lane.b32.xlu1 %v1484_v20, %s2086_s30  ;;  %v798_v20 = vstv %s1856_s0  ;;  %v943_v12 = vmul.f32 %v942_v1, %v2490_v37  ;;  %s1905_s0 = sld [smem:[#allocation8 + $0x20]] }
 0x3e9   :  { %v799_v63 = vmul.f32 %v798_v20, %v2482_v30  ;;  %v1002_v20 = vstv %s1875_s25 }
 0x3eb   :  { %1055 = vrot.lane.b32.xlu0 %v1053_v13, %s2089_s28  ;;  %v818_v13 = vstv %s1858_s11  ;;  %s1892_s11 = sld [smem:[#allocation8 + $0x26]] }
 0x3ec   :  { %891 = vrot.lane.b32.xlu1 %v889_v7, %s2089_s28  ;;  %v1105_v7 = vstv %s1884_s12  ;;  %v819_v62 = vmul.f32 %v818_v13, %v2482_v30  ;;  %s1933_s12 = sld [smem:[#allocation8 + $0x1b]] }
 0x3ed   :  { %v1106_v29 = vmul.f32 %v1105_v7, %v2492_v38  ;;  %v1309_v7 = vstv %s1903_s27 }
 0x3ef   :  { %1362 = vrot.lane.b32.xlu0 %v1360_v31, %s2088_s21  ;;  %v962_v31 = vstv %s1871_s16  ;;  %s1879_s16 = sld [smem:[#allocation8 + $0x2c]] }
 0x3f0   :  { %1198 = vrot.lane.b32.xlu1 %v1196_v32, %s2088_s21  ;;  %v1126_v32 = vmul.f32 %v1125_v9, %v2492_v38  ;;  %v963_v41 = vmul.f32 %v962_v31, %v2490_v37  ;;  %v1617_v31 = vstv %s1931_s7  ;;  %s1940_s7 = sld [smem:[#allocation8 + $0x61]] }
 0x3f3   :  { %1670 = vrot.lane.b32.xlu0 %v1668_v4, %s2087_s15  ;;  %v1269_v4 = vstv %s1899_s18  ;;  %s1907_s18 = sld [smem:[#allocation8 + $0x27]] }
 0x3f4   :  { %1506 = vrot.lane.b32.xlu1 %v1504_v36, %s2087_s15  ;;  %v1434_v36 = vmul.f32 %v1433_v42, %v2497_v43  ;;  %v1270_v44 = vmul.f32 %v1269_v4, %v2505_v53  ;;  %v1022_v4 = vstv %s1877_s9  ;;  %s1841_s9 = sld [smem:[#allocation8 + $0x38]] }
 0x3f7   :  { %1218 = vrot.lane.b32.xlu0 %v1216_v46, %s2089_s28  ;;  %v838_v46 = vstv %s1860_s19  ;;  %s1935_s19 = sld [smem:[#allocation8 + $0x22]] }
 0x3f8   :  { %1382 = vrot.lane.b32.xlu1 %v1380_v47, %s2089_s28  ;;  %v983_v47 = vmul.f32 %v982_v15, %v2490_v37  ;;  %v839_v51 = vmul.f32 %v838_v46, %v2482_v30  ;;  %v1329_v46 = vstv %s1905_s0  ;;  %s1843_s0 = sld [smem:[#allocation8 + $0x3f]] }
 0x3fb   :  { %1526 = vrot.lane.b32.xlu0 %v1524_v54, %s2088_s21  ;;  %v1145_v54 = vstv %s1888_s22  ;;  %s2651_s22 = sld [smem:[#allocation8 + $0x2f]] }
 0x3fc   :  { %1690 = vrot.lane.b32.xlu1 %v1688_v60, %s2088_s21  ;;  %v1290_v60 = vmul.f32 %v1289_v52, %v2505_v53  ;;  %v1146_v5 = vmul.f32 %v1145_v54, %v2492_v38  ;;  %v1330_v54 = vmul.f32 %v1329_v46, %v2505_v53 }
 0x3ff   :  { %781 = vrot.lane.b32.xlu0 %v779_v14, %s2084_s14  ;;  %v1453_v14 = vstv %s1916_s24  ;;  %s1839_s24 = sld [smem:[#allocation8 + $0x31]] }
 0x400   :  { %1546 = vrot.lane.b32.xlu1 %v1544_v45, %s2089_s28  ;;  %v1598_v45 = vmul.f32 %v1597_v6, %v2512_v59  ;;  %v1454_v1 = vmul.f32 %v1453_v14, %v2497_v43  ;;  %v1493_v6 = vstv %s1920_s13  ;;  %s1845_s13 = sld [smem:[#allocation8 + $0x46]] }
 0x403   :  { %945 = vrot.lane.b32.xlu0 %v943_v12, %s2084_s14  ;;  %v858_v12 = vstv %s1862_s26  ;;  %s2666_s26 = sld [smem:[#allocation8 + $0x30]] }
 0x404   :  { %801 = vrot.lane.b32.xlu1 %v799_v63, %s2085_s17  ;;  %v1003_v63 = vmul.f32 %v1002_v20, %v2490_v37  ;;  %v859_v13 = vmul.f32 %v858_v12, %v2482_v30  ;;  %v1042_v20 = vstv %s1879_s16  ;;  %v1205_v12 = vstv %s1894_s1  ;;  %s2091_s16 = smov 6   ;;  %s1846_s1 = sld [smem:[#allocation8 + $0x1c]] }
 0x407   :  { %821 = vrot.lane.b32.xlu0 %v819_v62, %s2086_s30  ;;  %v1165_v62 = vstv %s1890_s29 }
 0x408   :  { %1108 = vrot.lane.b32.xlu1 %v1106_v29, %s2084_s14  ;;  %v1310_v29 = vmul.f32 %v1309_v7, %v2505_v53  ;;  %v1166_v9 = vmul.f32 %v1165_v62, %v2492_v38  ;;  %v1043_v7 = vmul.f32 %v1042_v20, %v2490_v37  ;;  %v1206_v62 = vmul.f32 %v1205_v12, %v2492_v38 }
 0x40b   :  { %1128 = vrot.lane.b32.xlu0 %v1126_v32, %s2085_s17  ;;  %v1473_v32 = vstv %s1918_s8  ;;  %s1840_s8 = sld [smem:[#allocation8 + $0x7]] }
 0x40c   :  { %965 = vrot.lane.b32.xlu1 %v963_v41, %s2085_s17  ;;  %v1618_v41 = vmul.f32 %v1617_v31, %v2512_v59  ;;  %v1474_v42 = vmul.f32 %v1473_v32, %v2497_v43  ;;  %v1926_v31 = vld [vmem:[%s2979_s4 + $0x5] ss:$8 sm:$0x3] }
 0x40f   :  { %1436 = vrot.lane.b32.xlu0 %v1434_v36, %s2084_s14  ;;  %v878_v36 = vstv %s1864_s10  ;;  %s1842_s10 = sld [smem:[#allocation8 + $0xe]] }
 0x410   :  { %1272 = vrot.lane.b32.xlu1 %v1270_v44, %s2084_s14  ;;  %v1023_v44 = vmul.f32 %v1022_v4, %v2490_v37  ;;  %v879_v15 = vmul.f32 %v878_v36, %v2482_v30  ;;  %v1369_v4 = vstv %s1909_s20  ;;  %v1558_v36 = vrot.slane %v1926_v31, %v2256_v24  ;;  %s1851_s20 = sld [smem:[#allocation8 + $0x5b]] }
 0x413   :  { %985 = vrot.lane.b32.xlu0 %v983_v47, %s2086_s30  ;;  %v1185_v47 = vstv %s1892_s11  ;;  %s2090_s11 = smov 5  }
 0x414   :  { %841 = vrot.lane.b32.xlu1 %v839_v51, %s2087_s15 }
 0x417   :  { %1292 = vrot.lane.b32.xlu0 %v1290_v60, %s2085_s17  ;;  %v1186_v60 = vmul.f32 %v1185_v47, %v2492_v38 }
 0x418   :  { %1148 = vrot.lane.b32.xlu1 %v1146_v5, %s2086_s30  ;;  %v1637_v5 = vstv %s1933_s12  ;;  %s2709_s12 = sld [smem:[#allocation8 + $0x15]] }
 0x41b   :  { %1600 = vrot.lane.b32.xlu0 %v1598_v45, %s2084_s14  ;;  %v1638_v45 = vmul.f32 %v1637_v5, %v2512_v59  ;;  %v1533_v5 = vstv %s2651_s22  ;;  %s2097_s22 = smov 122  }
 0x41c   :  { %1456 = vrot.lane.b32.xlu1 %v1454_v1, %s2085_s17  ;;  %v1494_v1 = vmul.f32 %v1493_v6, %v2497_v43  ;;  %v1677_v6 = vstv %s2653_s23  ;;  %s610_s23 = sld [smem:[#allocation8]] }
 0x41f   :  { %1005 = vrot.lane.b32.xlu0 %v1003_v63, %s2087_s15 }
 0x420   :  { %861 = vrot.lane.b32.xlu1 %v859_v13, %s2088_s21 }
 0x423   :  { %1312 = vrot.lane.b32.xlu0 %v1310_v29, %s2086_s30  ;;  %v1349_v29 = vstv %s1907_s18  ;;  %s1847_s18 = sld [smem:[#allocation8 + $0x4d]] }
 0x424   :  { %1168 = vrot.lane.b32.xlu1 %v1166_v9, %s2087_s15  ;;  %v1513_v9 = vstv %s1922_s2  ;;  %v1350_v38 = vmul.f32 %v1349_v29, %v2505_v53  ;;  %v1697_v29 = vstv %s2666_s26  ;;  %s1848_s2 = sld [smem:[#allocation8 + $0x23]] }
 0x427   :  { %1620 = vrot.lane.b32.xlu0 %v1618_v41, %s2085_s17  ;;  %v1514_v41 = vmul.f32 %v1513_v9, %v2497_v43 }
 0x428   :  { %1476 = vrot.lane.b32.xlu1 %v1474_v42, %s2086_s30  ;;  %v1657_v42 = vstv %s1935_s19  ;;  %s1849_s19 = sld [smem:[#allocation8 + $0x54]] }
 0x42a   :  { %v706_v11 = vstv %s1848_s2 }
 0x42b   :  { %1025 = vrot.lane.b32.xlu0 %v1023_v44, %s2088_s21  ;;  %v1562_v44 = vrot.slane %v1926_v31, %v2253_v22 }
 0x42c   :  { %881 = vrot.lane.b32.xlu1 %v879_v15, %s2089_s28  ;;  %v1941_v15 = vld [vmem:[%s2979_s4 + $0x6] ss:$8 sm:$0x3] }
 0x42d   :  { %v2629_v51 = vpop.permute.xlu0 %955  ;;  %v1726_v20 = vrot.slane %v1941_v15, %v2253_v22 }
 0x42e   :  { %v2631_v52 = vpop.permute.xlu1 %791  ;;  %v717_v10 = vstv %s1849_s19 }
 0x42f   :  { %1332 = vrot.lane.b32.xlu0 %v1330_v54, %s2087_s15  ;;  %v1658_v54 = vmul.f32 %v1657_v42, %v2512_v59  ;;  %v1698_v42 = vmul.f32 %v1697_v29, %v2512_v59 }
 0x430   :  { %1188 = vrot.lane.b32.xlu1 %v1186_v60, %s2088_s21  ;;  %v1370_v60 = vmul.f32 %v1369_v4, %v2505_v53  ;;  %v1678_v53 = vmul.f32 %v1677_v6, %v2512_v59  ;;  %v1707_v4 = vstv %s1940_s7  ;;  %v631_v59 = vld [vmem:[#allocation3] sm:$0x3f] }
 0x431   :  { %v2637_v30 = vpop.permute.xlu0 %811 }
 0x432   :  { %v2639_v14 = vpop.permute.xlu1 %975  ;;  %v813_v2 = vrot.slane %v2637_v30, 2 }
 0x433   :  { %1640 = vrot.lane.b32.xlu0 %v1638_v45, %s2086_s30  ;;  %v1563_v45 = vcombine.low %v1558_v36, %v1562_v44 }
 0x434   :  { %1496 = vrot.lane.b32.xlu1 %v1494_v1, %s2087_s15  ;;  %v1722_v1 = vrot.slane %v1941_v15, %v2256_v24  ;;  %v1708_v15 = vmul.f32 %v1707_v4, %v2461_v0  ;;  %v654_v0 = vstv %s1843_s0  ;;  %v675_v4 = vstv %s1845_s13 }
 0x435   :  { %v2645_v63 = vpop.permute.xlu0 %1118  ;;  %v1570_v9 = vrot.slane %v1563_v45, %v2266_v33 }
 0x436   :  { %v2647_v13 = vpop.permute.xlu1 %1282  ;;  %v1727_v31 = vcombine.low %v1722_v1, %v1726_v20 }
 0x437   :  { %1045 = vrot.lane.b32.xlu0 %v1043_v7, %s2089_s28 }
 0x438   :  { %1208 = vrot.lane.b32.xlu1 %v1206_v62, %s2089_s28  ;;  %v1534_v62 = vmul.f32 %v1533_v5, %v2497_v43  ;;  %v1734_v43 = vrot.slane %v1727_v31, %v2266_v33  ;;  %v633_v5 = vstv %s1841_s9  ;;  %v655_v31 = vmul.f32 %v654_v0, %v631_v59 }
 0x439   :  { %v2660_v32 = vpop.permute.xlu0 %995  ;;  %v634_v20 = vmul.f32 %v633_v5, %v631_v59  ;;  %v676_v5 = vmul.f32 %v675_v4, %v631_v59 }
 0x43a   :  { %v2662_v37 = vpop.permute.xlu1 %831 }
 0x43b   :  { %1352 = vrot.lane.b32.xlu0 %v1350_v38, %s2088_s21  ;;  %v833_v33 = vrot.slane %v2662_v37, 2 }
 0x43c   :  { %1516 = vrot.lane.b32.xlu1 %v1514_v41, %s2088_s21 }
 0x43d   :  { %v2675_v46 = vpop.permute.xlu0 %1302 }
 0x43e   :  { %v2677_v47 = vpop.permute.xlu1 %1138 }
 0x43f   :  { %1660 = vrot.lane.b32.xlu0 %v1658_v54, %s2087_s15  ;;  %v619_v54 = vld [vmem:[#allocation2] sm:$0x3f] }
 0x440   :  { %1372 = vrot.lane.b32.xlu1 %v1370_v60, %s2089_s28  ;;  %v621_v60 = vstv %s1840_s8  ;;  %v707_v39 = vmul.f32 %v706_v11, %v619_v54 }
 0x441   :  { %v2687_v12 = vpop.permute.xlu0 %1610  ;;  %v622_v1 = vmul.f32 %v621_v60, %v619_v54 }
 0x442   :  { %v2689_v7 = vpop.permute.xlu1 %1446 }
 0x443   :  { %1536 = vrot.lane.b32.xlu0 %v1534_v62, %s2089_s28  ;;  %v643_v62 = vstv %s1842_s10 }
 0x444   :  { %1680 = vrot.lane.b32.xlu1 %v1678_v53, %s2088_s21 }
 0x445   :  { %v2697_v38 = vpop.permute.xlu0 %1015 }
 0x446   :  { %v2699_v41 = vpop.permute.xlu1 %851 }
 0x447   :  { %1700 = vrot.lane.b32.xlu0 %v1698_v42, %s2089_s28  ;;  %v664_v42 = vstv %s2709_s12 }
 0x448   :  { %1571 = vrot.lane.b32.xlu1 %v1570_v9, %s2090_s11  ;;  %v644_v9 = vmul.f32 %v643_v62, %v619_v54  ;;  %v665_v60 = vmul.f32 %v664_v42, %v619_v54 }
 0x449   :  { %v2704_v36 = vpop.permute.xlu0 %1322 }
 0x44a   :  { %v2706_v44 = vpop.permute.xlu1 %1158 }
 0x44b   :  { %1710 = vrot.lane.b32.xlu0 %v1708_v15, %s2089_s28 }
 0x44c   :  { %1735 = vrot.lane.b32.xlu1 %v1734_v43, %s2091_s16 }
 0x44d   :  { %v2712_v6 = vpop.permute.xlu0 %1630 }
 0x44e   :  { %v2714_v45 = vpop.permute.xlu1 %1466 }
 0x44f   :  { %624 = vrot.lane.b32.xlu0 %v622_v1, %s2084_s14  ;;  %v685_v1 = vstv %s1846_s1 }
 0x450   :  { %636 = vrot.lane.b32.xlu1 %v634_v20, %s2084_s14  ;;  %v696_v20 = vstv %s1847_s18  ;;  %s1850_s14 = sld [smem:[#allocation8 + $0x2a]] }
 0x451   :  { %v2718_v53 = vpop.permute.xlu0 %1035 }
 0x452   :  { %v2720_v29 = vpop.permute.xlu1 %871 }
 0x453   :  { %646 = vrot.lane.b32.xlu0 %v644_v9, %s2085_s17  ;;  %v686_v9 = vmul.f32 %v685_v1, %v619_v54 }
 0x454   :  { %657 = vrot.lane.b32.xlu1 %v655_v31, %s2085_s17  ;;  %v697_v31 = vmul.f32 %v696_v20, %v631_v59  ;;  %s2092_s17 = smov 127  }
 0x455   :  { %v2725_v43 = vpop.permute.xlu0 %1342 }
 0x456   :  { %v2727_v15 = vpop.permute.xlu1 %1178  ;;  %v727_v61 = vstv %s1850_s14 }
 0x457   :  { %667 = vrot.lane.b32.xlu0 %v665_v60, %s2086_s30  ;;  %v718_v60 = vmul.f32 %v717_v10, %v631_v59  ;;  %v728_v56 = vmul.f32 %v727_v61, %v619_v54  ;;  %v793_v61 = vrot.slane %v2631_v52, 2 }
 0x458   :  { %678 = vrot.lane.b32.xlu1 %v676_v5, %s2086_s30  ;;  %v737_v5 = vstv %s1851_s20  ;;  %s2093_s30 = smov 125  }
 0x459   :  { %v2731_v62 = vpop.permute.xlu0 %1650  ;;  %v794_v48 = vsel %vm627_vm3, %v2631_v52, %v793_v61  ;;  %v814_v61 = vsel %vm649_vm4, %v2637_v30, %v813_v2  ;;  %v834_v30 = vsel %vm670_vm5, %v2662_v37, %v833_v33  ;;  %v1448_v37 = vrot.slane %v2689_v7, 2 }
 0x45a   :  { %v2733_v0 = vpop.permute.xlu1 %1486 }
 0x45b   :  { %688 = vrot.lane.b32.xlu0 %v686_v9, %s2087_s15  ;;  %v738_v9 = vmul.f32 %v737_v5, %v631_v59  ;;  %v957_v59 = vrot.slane %v2629_v51, 2 }
 0x45c   :  { %699 = vrot.lane.b32.xlu1 %v697_v31, %s2087_s15  ;;  %s2094_s15 = smov 126  }
 0x45d   :  { %v2737_v42 = vpop.permute.xlu0 %1055 }
 0x45e   :  { %v2739_v4 = vpop.permute.xlu1 %891 }
 0x45f   :  { %709 = vrot.lane.b32.xlu0 %v707_v39, %s2088_s21 }
 0x460   :  { %720 = vrot.lane.b32.xlu1 %v718_v60, %s2088_s21  ;;  %s2095_s21 = smov 124  }
 0x461   :  { %v2743_v1 = vpop.permute.xlu0 %1362 }
 0x462   :  { %v2745_v20 = vpop.permute.xlu1 %1198 }
 0x463   :  { %730 = vrot.lane.b32.xlu0 %v728_v56, %s2089_s28 }
 0x464   :  { %740 = vrot.lane.b32.xlu1 %v738_v9, %s2089_s28  ;;  %s2096_s28 = smov 123  }
 0x465   :  { %v2749_v31 = vpop.permute.xlu0 %1670 }
 0x466   :  { %v2751_v11 = vpop.permute.xlu1 %1506 }
 0x469   :  { %v2753_v10 = vpop.permute.xlu0 %1218 }
 0x46a   :  { %v2755_v55 = vpop.permute.xlu1 %1382 }
 0x46d   :  { %v2757_v39 = vpop.permute.xlu0 %1526 }
 0x46e   :  { %v2759_v60 = vpop.permute.xlu1 %1690 }
 0x471   :  { %v782_v58 = vpop.permute.xlu0 %781 }
 0x472   :  { %v2761_v57 = vpop.permute.xlu1 %1546  ;;  %v783_v56 = vrot.slane %v782_v58, 2 }
 0x474   :  { %v784_v54 = vsel %vm627_vm3, %v782_v58, %v783_v56  ;;  %v958_v58 = vsel %vm627_vm3, %v2629_v51, %v957_v59  ;;  %v977_v59 = vrot.slane %v2639_v14, 2 }
 0x475   :  { %v786_v5 = vadd.f32 %v784_v54, %v2523_v21  ;;  %v946_v9 = vpop.permute.xlu0 %945  ;;  %v1120_v21 = vrot.slane %v2645_v63, 2 }
 0x476   :  { %v802_v49 = vpop.permute.xlu1 %801  ;;  %v947_v34 = vrot.slane %v946_v9, 2 }
 0x477   :  { %v803_v17 = vrot.slane %v802_v49, 2  ;;  %v796_v16 = vadd.f32 %v794_v48, %v786_v5 }
 0x478   :  { %v948_v19 = vsel %vm627_vm3, %v946_v9, %v947_v34  ;;  %v1140_v9 = vrot.slane %v2677_v47, 2 }
 0x479   :  { %v804_v18 = vsel %vm649_vm4, %v802_v49, %v803_v17  ;;  %v950_v56 = vadd.f32 %v948_v19, %v2525_v3  ;;  %v822_v50 = vpop.permute.xlu0 %821 }
 0x47a   :  { %v806_v54 = vadd.f32 %v804_v18, %v796_v16  ;;  %v1109_v52 = vpop.permute.xlu1 %1108  ;;  %v823_v48 = vrot.slane %v822_v50, 2  ;;  %v1121_v16 = vsel %vm627_vm3, %v2645_v63, %v1120_v21  ;;  %v978_v63 = vsel %vm649_vm4, %v2639_v14, %v977_v59 }
 0x47b   :  { %v1110_v5 = vrot.slane %v1109_v52, 2  ;;  %v960_v17 = vadd.f32 %v958_v58, %v950_v56  ;;  %v1141_v33 = vsel %vm649_vm4, %v2677_v47, %v1140_v9  ;;  %v1449_v9 = vsel %vm627_vm3, %v2689_v7, %v1448_v37 }
 0x47c   :  { %v816_v34 = vadd.f32 %v814_v61, %v806_v54  ;;  %v824_v49 = vsel %vm670_vm5, %v822_v50, %v823_v48 }
 0x47d   :  { %v1111_v51 = vsel %vm627_vm3, %v1109_v52, %v1110_v5  ;;  %v1129_v2 = vpop.permute.xlu0 %1128 }
 0x47e   :  { %v826_v18 = vadd.f32 %v824_v49, %v816_v34  ;;  %v1113_v19 = vadd.f32 %v1111_v51, %v2529_v28  ;;  %v966_v3 = vpop.permute.xlu1 %965  ;;  %v1130_v58 = vrot.slane %v1129_v2, 2  ;;  %v1284_v28 = vrot.slane %v2647_v13, 2 }
 0x47f   :  { %v967_v56 = vrot.slane %v966_v3, 2 }
 0x480   :  { %v1123_v50 = vadd.f32 %v1121_v16, %v1113_v19  ;;  %v836_v54 = vadd.f32 %v834_v30, %v826_v18  ;;  %v1131_v52 = vsel %vm649_vm4, %v1129_v2, %v1130_v58  ;;  %v1285_v14 = vsel %vm627_vm3, %v2647_v13, %v1284_v28 }
 0x481   :  { %v968_v61 = vsel %vm649_vm4, %v966_v3, %v967_v56  ;;  %v1437_v5 = vpop.permute.xlu0 %1436  ;;  %v853_v58 = vrot.slane %v2699_v41, 2 }
 0x482   :  { %v1133_v21 = vadd.f32 %v1131_v52, %v1123_v50  ;;  %v970_v48 = vadd.f32 %v968_v61, %v960_v17  ;;  %v1273_v34 = vpop.permute.xlu1 %1272  ;;  %v1438_v49 = vrot.slane %v1437_v5, 2  ;;  %v997_v17 = vrot.slane %v2660_v32, 2 }
 0x483   :  { %v1274_v51 = vrot.slane %v1273_v34, 2 }
 0x484   :  { %v980_v16 = vadd.f32 %v978_v63, %v970_v48  ;;  %v1143_v18 = vadd.f32 %v1141_v33, %v1133_v21  ;;  %v1439_v19 = vsel %vm627_vm3, %v1437_v5, %v1438_v49  ;;  %v854_v5 = vsel %vm691_vm6, %v2699_v41, %v853_v58 }
 0x485   :  { %v1275_v2 = vsel %vm627_vm3, %v1273_v34, %v1274_v51  ;;  %v1441_v59 = vadd.f32 %v1439_v19, %v2531_v8  ;;  %v986_v47 = vpop.permute.xlu0 %985  ;;  %v998_v8 = vsel %vm670_vm5, %v2660_v32, %v997_v17  ;;  %v1160_v34 = vrot.slane %v2706_v44, 2 }
 0x486   :  { %v1277_v3 = vadd.f32 %v1275_v2, %v2537_v35  ;;  %v842_v30 = vpop.permute.xlu1 %841  ;;  %v987_v56 = vrot.slane %v986_v47, 2  ;;  %v1304_v35 = vrot.slane %v2675_v46, 2 }
 0x487   :  { %v843_v50 = vrot.slane %v842_v30, 2  ;;  %v1451_v61 = vadd.f32 %v1449_v9, %v1441_v59  ;;  %v1161_v41 = vsel %vm670_vm5, %v2706_v44, %v1160_v34 }
 0x488   :  { %v1287_v52 = vadd.f32 %v1285_v14, %v1277_v3  ;;  %v988_v13 = vsel %vm670_vm5, %v986_v47, %v987_v56  ;;  %v1305_v32 = vsel %vm649_vm4, %v2675_v46, %v1304_v35  ;;  %v1468_v3 = vrot.slane %v2714_v45, 2 }
 0x489   :  { %v844_v63 = vsel %vm691_vm6, %v842_v30, %v843_v50  ;;  %v990_v28 = vadd.f32 %v988_v13, %v980_v16  ;;  %v1293_v48 = vpop.permute.xlu0 %1292  ;;  %v873_v35 = vrot.slane %v2720_v29, 2 }
 0x48a   :  { %v846_v21 = vadd.f32 %v844_v63, %v836_v54  ;;  %v1149_v7 = vpop.permute.xlu1 %1148  ;;  %v1294_v33 = vrot.slane %v1293_v48, 2  ;;  %v1612_v54 = vrot.slane %v2687_v12, 2 }
 0x48b   :  { %v1150_v37 = vrot.slane %v1149_v7, 2  ;;  %v1000_v49 = vadd.f32 %v998_v8, %v990_v28  ;;  %v1469_v8 = vsel %vm649_vm4, %v2714_v45, %v1468_v3 }
 0x48c   :  { %v856_v51 = vadd.f32 %v854_v5, %v846_v21  ;;  %v1295_v19 = vsel %vm649_vm4, %v1293_v48, %v1294_v33  ;;  %v1613_v46 = vsel %vm627_vm3, %v2687_v12, %v1612_v54 }
 0x48d   :  { %v1151_v2 = vsel %vm670_vm5, %v1149_v7, %v1150_v37  ;;  %v1297_v16 = vadd.f32 %v1295_v19, %v1287_v52  ;;  %v1601_v17 = vpop.permute.xlu0 %1600  ;;  %v874_v19 = vsel %vm712_vm9, %v2720_v29, %v873_v35  ;;  %v893_v35 = vrot.slane %v2739_v4, 2 }
 0x48e   :  { %v1153_v14 = vadd.f32 %v1151_v2, %v1143_v18  ;;  %v1457_v59 = vpop.permute.xlu1 %1456  ;;  %v1602_v47 = vrot.slane %v1601_v17, 2  ;;  %v1017_v18 = vrot.slane %v2697_v38, 2  ;;  %v1180_v2 = vrot.slane %v2727_v15, 2 }
 0x48f   :  { %v1458_v30 = vrot.slane %v1457_v59, 2  ;;  %v1307_v9 = vadd.f32 %v1305_v32, %v1297_v16 }
 0x490   :  { %v1163_v58 = vadd.f32 %v1161_v41, %v1153_v14  ;;  %v1603_v56 = vsel %vm627_vm3, %v1601_v17, %v1602_v47  ;;  %v1181_v29 = vsel %vm691_vm6, %v2727_v15, %v1180_v2 }
 0x491   :  { %v1459_v50 = vsel %vm649_vm4, %v1457_v59, %v1458_v30  ;;  %v1605_v52 = vadd.f32 %v1603_v56, %v2541_v40  ;;  %v1006_v63 = vpop.permute.xlu0 %1005  ;;  %v1018_v40 = vsel %vm691_vm6, %v2697_v38, %v1017_v18  ;;  %v1488_v30 = vrot.slane %v2733_v0, 2 }
 0x492   :  { %v1461_v13 = vadd.f32 %v1459_v50, %v1451_v61  ;;  %v862_v44 = vpop.permute.xlu1 %861  ;;  %v1007_v28 = vrot.slane %v1006_v63, 2  ;;  %v1324_v61 = vrot.slane %v2704_v36, 2 }
 0x493   :  { %v863_v21 = vrot.slane %v862_v44, 2  ;;  %v1615_v48 = vadd.f32 %v1613_v46, %v1605_v52  ;;  %v1489_v15 = vsel %vm670_vm5, %v2733_v0, %v1488_v30 }
 0x494   :  { %v1471_v7 = vadd.f32 %v1469_v8, %v1461_v13  ;;  %v1008_v5 = vsel %vm691_vm6, %v1006_v63, %v1007_v28  ;;  %v1325_v38 = vsel %vm670_vm5, %v2704_v36, %v1324_v61  ;;  %v1344_v61 = vrot.slane %v2725_v43, 2 }
 0x495   :  { %v864_v12 = vsel %vm712_vm9, %v862_v44, %v863_v21  ;;  %v1010_v34 = vadd.f32 %v1008_v5, %v1000_v49  ;;  %v1313_v37 = vpop.permute.xlu0 %1312  ;;  %v1632_v49 = vrot.slane %v2712_v6, 2 }
 0x496   :  { %v866_v33 = vadd.f32 %v864_v12, %v856_v51  ;;  %v1169_v45 = vpop.permute.xlu1 %1168  ;;  %v1314_v32 = vrot.slane %v1313_v37, 2 }
 0x497   :  { %v1170_v54 = vrot.slane %v1169_v45, 2  ;;  %v1020_v16 = vadd.f32 %v1018_v40, %v1010_v34  ;;  %v1633_v36 = vsel %vm649_vm4, %v2712_v6, %v1632_v49  ;;  %v918_v40 = vrot.slane %v2379_v23, 6 }
 0x498   :  { %v876_v14 = vadd.f32 %v874_v19, %v866_v33  ;;  %v1315_v17 = vsel %vm670_vm5, %v1313_v37, %v1314_v32  ;;  %v1200_v19 = vrot.slane %v2745_v20, 2 }
 0x499   :  { %v1171_v59 = vsel %vm691_vm6, %v1169_v45, %v1170_v54  ;;  %v1317_v51 = vadd.f32 %v1315_v17, %v1307_v9  ;;  %v1621_v3 = vpop.permute.xlu0 %1620  ;;  %v1037_v9 = vrot.slane %v2718_v53, 2  ;;  %v894_v45 = vsel %vm233_vm7, %v2739_v4, %v893_v35 }
 0x49a   :  { %v1173_v41 = vadd.f32 %v1171_v59, %v1163_v58  ;;  %v1477_v47 = vpop.permute.xlu1 %1476  ;;  %v1622_v56 = vrot.slane %v1621_v3, 2  ;;  %v920_v59 = vsel %vm919_vm10, %v918_v40, %v2379_v23  ;;  %v1082_v35 = vrot.slane %v2383_v26, 6 }
 0x49b   :  { %v1478_v50 = vrot.slane %v1477_v47, 2  ;;  %v1327_v46 = vadd.f32 %v1325_v38, %v1317_v51  ;;  %v1345_v38 = vsel %vm691_vm6, %v2725_v43, %v1344_v61 }
 0x49c   :  { %v1183_v18 = vadd.f32 %v1181_v29, %v1173_v41  ;;  %v1623_v52 = vsel %vm649_vm4, %v1621_v3, %v1622_v56  ;;  %v1508_v29 = vrot.slane %v2751_v11, 2 }
 0x49d   :  { %v1479_v13 = vsel %vm670_vm5, %v1477_v47, %v1478_v50  ;;  %v1625_v58 = vadd.f32 %v1623_v52, %v1615_v48  ;;  %v1026_v44 = vpop.permute.xlu0 %1025  ;;  %v1201_v47 = vsel %vm712_vm9, %v2745_v20, %v1200_v19 }
 0x49e   :  { %v1481_v63 = vadd.f32 %v1479_v13, %v1471_v7  ;;  %v882_v8 = vpop.permute.xlu1 %881  ;;  %v1027_v28 = vrot.slane %v1026_v44, 2  ;;  %v1038_v7 = vsel %vm712_vm9, %v2718_v53, %v1037_v9 }
 0x49f   :  { %v883_v21 = vrot.slane %v882_v8, 2  ;;  %v1635_v5 = vadd.f32 %v1633_v36, %v1625_v58  ;;  %v1509_v58 = vsel %vm691_vm6, %v2751_v11, %v1508_v29  ;;  %v1364_v11 = vrot.slane %v2743_v1, 2 }
 0x4a0   :  { %v1491_v12 = vadd.f32 %v1489_v15, %v1481_v63  ;;  %v1028_v6 = vsel %vm712_vm9, %v1026_v44, %v1027_v28  ;;  %v1220_v63 = vrot.slane %v2753_v10, 2  ;;  %v1245_v15 = vrot.slane %v2381_v25, 6 }
 0x4a1   :  { %v884_v48 = vsel %vm233_vm7, %v882_v8, %v883_v21  ;;  %v1030_v34 = vadd.f32 %v1028_v6, %v1020_v16  ;;  %v1333_v33 = vpop.permute.xlu0 %1332 }
 0x4a2   :  { %v886_v0 = vadd.f32 %v884_v48, %v876_v14  ;;  %v1189_v37 = vpop.permute.xlu1 %1188  ;;  %v1334_v2 = vrot.slane %v1333_v33, 2  ;;  %v1652_v14 = vrot.slane %v2731_v62, 2 }
 0x4a3   :  { %v1190_v32 = vrot.slane %v1189_v37, 2  ;;  %v1040_v17 = vadd.f32 %v1038_v7, %v1030_v34  ;;  %v1221_v7 = vsel %vm233_vm7, %v2753_v10, %v1220_v63  ;;  %v1528_v34 = vrot.slane %v2757_v39, 2 }
 0x4a4   :  { %v896_v54 = vadd.f32 %v894_v45, %v886_v0  ;;  %v1335_v53 = vsel %vm691_vm6, %v1333_v33, %v1334_v2  ;;  %v1083_v45 = vsel %vm309_vm8, %v1082_v35, %v2383_v26  ;;  %v1672_v2 = vrot.slane %v2749_v31, 2 }
 0x4a5   :  { %v1191_v16 = vsel %vm712_vm9, %v1189_v37, %v1190_v32  ;;  %v1337_v51 = vadd.f32 %v1335_v53, %v1327_v46  ;;  %v1641_v41 = vpop.permute.xlu0 %1640  ;;  %v1653_v46 = vsel %vm670_vm5, %v2731_v62, %v1652_v14  ;;  %v1247_v37 = vsel %vm1246_vm11, %v1245_v15, %v2381_v25 }
 0x4a6   :  { %v922_v49 = vmul.f32 %v920_v59, %v896_v54  ;;  %v1193_v4 = vadd.f32 %v1191_v16, %v1183_v18  ;;  %v1497_v3 = vpop.permute.xlu1 %1496  ;;  %v1642_v23 = vrot.slane %v1641_v41, 2  ;;  %v1057_v18 = vrot.slane %v2737_v42, 2 }
 0x4a7   :  { %v1498_v30 = vrot.slane %v1497_v3, 2  ;;  %v1347_v56 = vadd.f32 %v1345_v38, %v1337_v51  ;;  %v1384_v32 = vrot.slane %v2755_v55, 2  ;;  %v1365_v25 = vsel %vm712_vm9, %v2743_v1, %v1364_v11 }
 0x4a8   :  { %924 = vrot.lane.b32.xlu0 %v922_v49, %s2092_s17  ;;  %v1203_v43 = vadd.f32 %v1201_v47, %v1193_v4  ;;  %v1643_v50 = vsel %vm670_vm5, %v1641_v41, %v1642_v23  ;;  %v1529_v26 = vsel %vm712_vm9, %v2757_v39, %v1528_v34  ;;  %vm1410_vm8 = vcmask 31744  }
 0x4a9   :  { %v1499_v52 = vsel %vm691_vm6, %v1497_v3, %v1498_v30  ;;  %v1645_v13 = vadd.f32 %v1643_v50, %v1635_v5  ;;  %v1046_v20 = vpop.permute.xlu0 %1045  ;;  %v1409_v3 = vrot.slane %v2385_v27, 6  ;;  %v1673_v1 = vsel %vm691_vm6, %v2749_v31, %v1672_v2 }
 0x4aa   :  { %v1501_v36 = vadd.f32 %v1499_v52, %v1491_v12  ;;  %v1209_v9 = vpop.permute.xlu1 %1208  ;;  %v1047_v44 = vrot.slane %v1046_v20, 2  ;;  %v1058_v12 = vsel %vm233_vm7, %v2737_v42, %v1057_v18  ;;  %v1385_v39 = vsel %vm233_vm7, %v2755_v55, %v1384_v32 }
 0x4ab   :  { %v1210_v8 = vrot.slane %v1209_v9, 2  ;;  %v1655_v21 = vadd.f32 %v1653_v46, %v1645_v13  ;;  %v1692_v50 = vrot.slane %v2759_v60, 2  ;;  %v1548_v52 = vrot.slane %v2761_v57, 2 }
 0x4ac   :  { %v1511_v28 = vadd.f32 %v1509_v58, %v1501_v36  ;;  %v1048_v62 = vsel %vm233_vm7, %v1046_v20, %v1047_v44  ;;  %v1411_v20 = vsel %vm1410_vm8, %v1409_v3, %v2385_v27 }
 0x4ad   :  { %v1211_v5 = vsel %vm233_vm7, %v1209_v9, %v1210_v8  ;;  %v1050_v40 = vadd.f32 %v1048_v62, %v1040_v17  ;;  %v1353_v6 = vpop.permute.xlu0 %1352  ;;  %v1693_v15 = vsel %vm712_vm9, %v2759_v60, %v1692_v50  ;;  %v1549_v35 = vsel %vm233_vm7, %v2761_v57, %v1548_v52 }
 0x4ae   :  { %v1213_v61 = vadd.f32 %v1211_v5, %v1203_v43  ;;  %v1517_v48 = vpop.permute.xlu1 %1516  ;;  %v1354_v0 = vrot.slane %v1353_v6, 2 }
 0x4af   :  { %v1518_v33 = vrot.slane %v1517_v48, 2  ;;  %v1060_v19 = vadd.f32 %v1058_v12, %v1050_v40 }
 0x4b0   :  { %v1223_v42 = vadd.f32 %v1221_v7, %v1213_v61  ;;  %v1355_v54 = vsel %vm712_vm9, %v1353_v6, %v1354_v0 }
 0x4b1   :  { %v1519_v17 = vsel %vm712_vm9, %v1517_v48, %v1518_v33  ;;  %v1085_v10 = vmul.f32 %v1083_v45, %v1060_v19  ;;  %v1357_v38 = vadd.f32 %v1355_v54, %v1347_v56  ;;  %v1661_v16 = vpop.permute.xlu0 %1660  ;;  %v611_v45 = vstv %s610_s23 }
 0x4b2   :  { %v1249_v59 = vmul.f32 %v1247_v37, %v1223_v42  ;;  %v1521_v53 = vadd.f32 %v1519_v17, %v1511_v28  ;;  %v1373_v14 = vpop.permute.xlu1 %1372  ;;  %v1662_v49 = vrot.slane %v1661_v16, 2  ;;  %v609_v37 = vld [vmem:[#allocation2] sm:$0xf]  ;;  %v616_v19 = vstv %s1839_s24  ;;  %v614_v42 = vld [vmem:[#allocation3] sm:$0xf] }
 0x4b3   :  { %v1374_v51 = vrot.slane %v1373_v14, 2  ;;  %v1367_v4 = vadd.f32 %v1365_v25, %v1357_v38  ;;  %1087 = vrot.lane.b32.xlu1 %v1085_v10, %s2094_s15  ;;  %v612_v32 = vmul.f32 %v611_v45, %v609_v37  ;;  %v617_v54 = vmul.f32 %v616_v19, %v614_v42 }
 0x4b4   :  { %1251 = vrot.lane.b32.xlu0 %v1249_v59, %s2093_s30  ;;  %v1531_v41 = vadd.f32 %v1529_v26, %v1521_v53  ;;  %v1663_v47 = vsel %vm691_vm6, %v1661_v16, %v1662_v49 }
 0x4b5   :  { %v1375_v29 = vsel %vm233_vm7, %v1373_v14, %v1374_v51  ;;  %v1665_v23 = vadd.f32 %v1663_v47, %v1655_v21  ;;  %v1537_v43 = vpop.permute.xlu0 %1536  ;;  %v618_v59 = vadd.f32 %v617_v54, %v612_v32 }
 0x4b6   :  { %v1377_v30 = vadd.f32 %v1375_v29, %v1367_v4  ;;  %v1681_v56 = vpop.permute.xlu1 %1680  ;;  %v1538_v46 = vrot.slane %v1537_v43, 2 }
 0x4b7   :  { %v1682_v18 = vrot.slane %v1681_v56, 2  ;;  %v1675_v36 = vadd.f32 %v1673_v1, %v1665_v23 }
 0x4b8   :  { %v1387_v13 = vadd.f32 %v1385_v39, %v1377_v30  ;;  %v1539_v31 = vsel %vm233_vm7, %v1537_v43, %v1538_v46 }
 0x4b9   :  { %v1683_v9 = vsel %vm712_vm9, %v1681_v56, %v1682_v18  ;;  %v1541_v58 = vadd.f32 %v1539_v31, %v1531_v41  ;;  %v1701_v44 = vpop.permute.xlu0 %1700 }
 0x4ba   :  { %v1413_v55 = vmul.f32 %v1411_v20, %v1387_v13  ;;  %v1685_v63 = vadd.f32 %v1683_v9, %v1675_v36  ;;  %v1572_v8 = vpop.permute.xlu1 %1571  ;;  %v1702_v28 = vrot.slane %v1701_v44, 2 }
 0x4bb   :  { %v1573_v21 = vrot.slane %v1572_v8, 6  ;;  %v1551_v27 = vadd.f32 %v1549_v35, %v1541_v58 }
 0x4bc   :  { %v1695_v62 = vadd.f32 %v1693_v15, %v1685_v63  ;;  %1415 = vrot.lane.b32.xlu1 %v1413_v55, %s2095_s21  ;;  %v1703_v5 = vsel %vm233_vm7, %v1701_v44, %v1702_v28 }
 0x4bd   :  { %v1575_v12 = vsel %vm1574_vm12, %v1573_v21, %v1572_v8  ;;  %v1711_v40 = vpop.permute.xlu0 %1710  ;;  %v746_v21 = vld [vmem:[%s2979_s4] ss:$8 sm:$0x3]  ;;  %s2099_s4 = smov [#allocation9]  }
 0x4be   :  { %v1577_v11 = vmul.f32 %v1575_v12, %v1551_v27  ;;  %v1736_v61 = vpop.permute.xlu1 %1735  ;;  %v1712_v6 = vrot.slane %v1711_v40, 2  ;;  %v1705_v7 = vadd.f32 %v1703_v5, %v1695_v62  ;;  %v751_v12 = vrot.slane %v746_v21, %v2256_v24  ;;  %s1822_s27 = sshll.u32 %s2099_s4, 4  ;;  %s1823_s27 = int_to_ptr.vmem [resolvable:$true] %s1822_s27 }
 0x4bf   :  { %v1737_v48 = vrot.slane %v1736_v61, 6  ;;  %s2043_s29 = scalar_lea.vmem %s1823_s27, 2048  ;;  %p2048_p0 = scmp.lt.s32.totalorder %s1823_s27, %s1823_s27 }
 0x4c0   :  { %1579 = vrot.lane.b32.xlu0 %v1577_v11, %s2096_s28  ;;  %v1713_v57 = vsel %vm233_vm7, %v1711_v40, %v1712_v6  ;;  %v755_v11 = vrot.slane %v746_v21, %v2253_v22  ;;  %v3023_v21 = vld [vmem:[#allocation27_spill] sm:$0xff]  ;;  %p2044_p13 = scmp.ne.s32.totalorder %s1823_s27, %s2043_s29  ;;  %p2049_p1 = scmp.lt.s32.totalorder %s2043_s29, %s2043_s29 }
 0x4c1   :  { %v1715_v60 = vadd.f32 %v1713_v57, %v1705_v7  ;;  %v1739_v34 = vsel %vm1738_vm13, %v1737_v48, %v1736_v61  ;;  %v625_v33 = vpop.permute.xlu0 %624 }
 0x4c2   :  { %v626_v2 = vrot.slane %v625_v33, 2  ;;  %v637_v17 = vpop.permute.xlu1 %636  ;;  %v756_v48 = vcombine.low %v751_v12, %v755_v11  ;;  %v3025_v12 = vld [vmem:[#allocation29_spill] sm:$0xff]  ;;  %p2050_p2 = por %p2049_p1, %p2048_p0 }
 0x4c3   :  { %v1741_v0 = vmul.f32 %v1739_v34, %v1715_v60  ;;  %v638_v53 = vrot.slane %v637_v17, 2 }
 0x4c4   :  { %v628_v10 = vsel %vm627_vm3, %v625_v33, %v626_v2  ;;  %v3017_v33 = vld [vmem:[#allocation14_spill] sm:$0xff]  ;;  %p2051_p3 = pnand %p2050_p2, %p2044_p13 }
 0x4c5   :  { %1743 = vrot.lane.b32.xlu1 %v1741_v0, %s2097_s22  ;;  %v647_v38 = vpop.permute.xlu0 %646  ;;  %v630_v16 = vadd.f32 %v628_v10, %v618_v59  ;;  %v639_v25 = vsel %vm627_vm3, %v637_v17, %v638_v53  ;;  %v763_v37 = vrot.slane %v756_v48, %v3017_v33 }
 0x4c6   :  { %v648_v14 = vrot.slane %v647_v38, 2  ;;  %v658_v49 = vpop.permute.xlu1 %657 }
 0x4c7   :  { %v641_v26 = vadd.f32 %v639_v25, %v630_v16  ;;  %v659_v41 = vrot.slane %v658_v49, 2 }
 0x4c8   :  { %v650_v51 = vsel %vm649_vm4, %v647_v38, %v648_v14 }
 0x4c9   :  { %v668_v4 = vpop.permute.xlu0 %667  ;;  %v652_v3 = vadd.f32 %v650_v51, %v641_v26  ;;  %v660_v29 = vsel %vm649_vm4, %v658_v49, %v659_v41 }
 0x4ca   :  { %v669_v47 = vrot.slane %v668_v4, 2  ;;  %v679_v39 = vpop.permute.xlu1 %678 }
 0x4cb   :  { %v662_v1 = vadd.f32 %v660_v29, %v652_v3  ;;  %v680_v43 = vrot.slane %v679_v39, 2 }
 0x4cc   :  { %v671_v23 = vsel %vm670_vm5, %v668_v4, %v669_v47 }
 0x4cd   :  { %v689_v30 = vpop.permute.xlu0 %688  ;;  %v673_v56 = vadd.f32 %v671_v23, %v662_v1  ;;  %v681_v52 = vsel %vm670_vm5, %v679_v39, %v680_v43 }
 0x4ce   :  { %v690_v50 = vrot.slane %v689_v30, 2  ;;  %v700_v18 = vpop.permute.xlu1 %699 }
 0x4cf   :  { %v683_v46 = vadd.f32 %v681_v52, %v673_v56  ;;  %v701_v20 = vrot.slane %v700_v18, 2 }
 0x4d0   :  { %v692_v13 = vsel %vm691_vm6, %v689_v30, %v690_v50  ;;  %v2098_v30 = vmov 1966171168   ;;  %v3018_v50 = vld [vmem:[#allocation13_spill] sm:$0xff] }
 0x4d1   :  { %v710_v36 = vpop.permute.xlu0 %709  ;;  %v694_v31 = vadd.f32 %v692_v13, %v683_v46  ;;  %v702_v55 = vsel %vm691_vm6, %v700_v18, %v701_v20  ;;  %v1758_v43 = vunpack.c.l.s4 %v2098_v30 }
 0x4d2   :  { %v711_v9 = vrot.slane %v710_v36, 2  ;;  %v721_v63 = vpop.permute.xlu1 %720 }
 0x4d3   :  { %v704_v58 = vadd.f32 %v702_v55, %v694_v31  ;;  %v722_v15 = vrot.slane %v721_v63, 2  ;;  %v1759_v56 = vunpack.c.0.s8 %v1758_v43  ;;  %v3019_v55 = vld [vmem:[#allocation25_spill] sm:$0xff] }
 0x4d4   :  { %v713_v44 = vsel %vm712_vm9, %v710_v36, %v711_v9 }
 0x4d5   :  { %v731_v8 = vpop.permute.xlu0 %730  ;;  %v715_v35 = vadd.f32 %v713_v44, %v704_v58  ;;  %v723_v62 = vsel %vm712_vm9, %v721_v63, %v722_v15  ;;  %v1762_v52 = vsub.s32 %v1759_v56, %v3018_v50  ;;  %v3020_v63 = vld [vmem:[#allocation26_spill] sm:$0xff] }
 0x4d6   :  { %v732_v28 = vrot.slane %v731_v8, 2  ;;  %v741_v5 = vpop.permute.xlu1 %740 }
 0x4d7   :  { %v725_v27 = vadd.f32 %v723_v62, %v715_v35  ;;  %v742_v61 = vrot.slane %v741_v5, 2  ;;  %v3022_v35 = vld [vmem:[#allocation24_spill] sm:$0xff] }
 0x4d8   :  { %v733_v40 = vsel %vm233_vm7, %v731_v8, %v732_v28  ;;  %v3021_v8 = vld [vmem:[#allocation23_spill] sm:$0xff] }
 0x4d9   :  { %v735_v6 = vadd.f32 %v733_v40, %v725_v27  ;;  %v743_v60 = vsel %vm233_vm7, %v741_v5, %v742_v61  ;;  %vm1582_vm7 = vcmask 1006592   ;;  %v3024_v27 = vld [vmem:[#allocation28_spill] sm:$0xff]  ;;  %v3026_v40 = vld [vmem:[#allocation30_spill] sm:$0xff]  ;;  %v3027_v61 = vld [vmem:[#allocation17_spill] sm:$0xff] }
 0x4db   :  { %v745_v0 = vadd.f32 %v743_v60, %v735_v6  ;;  %v3028_v6 = vld [vmem:[#allocation18_spill] sm:$0xff]  ;;  %v3030_v60 = vld [vmem:[#allocation16_spill] sm:$0xff] }
 0x4dd   :  { %v765_v42 = vmul.f32 %v763_v37, %v745_v0  ;;  %v3031_v0 = vld [vmem:[#allocation19_spill] sm:$0xff]  ;;  %v3032_v37 = vld [vmem:[#allocation20_spill] sm:$0xff] }
 0x51a   :  { %v925_v7 = vpop.permute.xlu0 %924 }
 0x51b   :  { %v926_v34 = vrot.slane %v925_v7, 2 }
 0x51d   :  { %v928_v19 = vsel %vm927_vm14, %v925_v7, %v926_v34  ;;  %v3029_v7 = vld [vmem:[#allocation15_spill] sm:$0xff] }
 0x51e   :  { %v930_v17 = vadd.f32 %v928_v19, %v765_v42  ;;  %v3033_v19 = vld [vmem:[#allocation21_spill] sm:$0xff] }
 0x525   :  { %v1088_v57 = vpop.permute.xlu1 %1087 }
 0x526   :  { %v1089_v45 = vrot.slane %v1088_v57, 2  ;;  %v1252_v2 = vpop.permute.xlu0 %1251 }
 0x527   :  { %v1253_v10 = vrot.slane %v1252_v2, 2 }
 0x528   :  { %v1091_v54 = vsel %vm1090_vm15, %v1088_v57, %v1089_v45 }
 0x529   :  { %v1093_v38 = vadd.f32 %v1091_v54, %v930_v17  ;;  %v1255_v14 = vsel %vm1254_vm0, %v1252_v2, %v1253_v10  ;;  %v3034_v2 = vld [vmem:[#allocation22_spill] sm:$0xff] }
 0x52b   :  { %v1257_v26 = vadd.f32 %v1255_v14, %v1093_v38 }
 0x52e   :  { %v1416_v32 = vpop.permute.xlu1 %1415 }
 0x52f   :  { %v1417_v59 = vrot.slane %v1416_v32, 2 }
 0x531   :  { %v1419_v25 = vsel %vm1418_vm1, %v1416_v32, %v1417_v59 }
 0x532   :  { %v1580_v53 = vpop.permute.xlu0 %1579  ;;  %v1421_v51 = vadd.f32 %v1419_v25, %v1257_v26 }
 0x533   :  { %v1581_v16 = vrot.slane %v1580_v53, 2 }
 0x535   :  { %v1583_v49 = vsel %vm1582_vm7, %v1580_v53, %v1581_v16 }
 0x536   :  { %v1585_v3 = vadd.f32 %v1583_v49, %v1421_v51 }
 0x537   :  { %v1744_v4 = vpop.permute.xlu1 %1743 }
 0x538   :  { %v1745_v41 = vrot.slane %v1744_v4, 2 }
 0x53a   :  { %v1747_v47 = vsel %vm1746_vm2, %v1744_v4, %v1745_v41 }
 0x53b   :  { %v1749_v29 = vadd.f32 %v1747_v47, %v1585_v3 }
 0x53d   :  { %v1942_v1 = vmul.f32 -1.442695, %v1749_v29 }
 0x53f   :  { %2005 = vpow2.f32 %v1942_v1 }
 0x549   :  { %v2006_v39 = vpop.eup %2005 }
 0x54a   :  { %v1753_v23 = vadd.f32 1.0, %v2006_v39 }
 0x54c   :  { %2007 = vrcp.f32 %v1753_v23 }
 0x556   :  { %v2008_v46 = vpop.eup %2007 }
 0x557   :  { %v1763_v18 = vrot.slane %v2008_v46, %v1762_v52 }
 0x559   :  { %v1764_v13 = vcombine.high %v1763_v18, %v1763_v18  ;;  %v1768_v36 = vrot.slane %v1763_v18, %v2256_v24  ;;  %v1772_v20 = vrot.slane %v1763_v18, %v2253_v22 }
 0x55b   :  { %v1776_v31 = vrot.slane %v1764_v13, %v2256_v24  ;;  %v1780_v9 = vrot.slane %v1764_v13, %v2253_v22  ;;  %v1785_v58 = vmul.f32 %v1768_v36, %v3019_v55  ;;  %v1786_v44 = vmul.f32 %v1772_v20, %v3020_v63 }
 0x55c   :  { %v1787_v15 = vmul.f32 %v1768_v36, %v3021_v8  ;;  %v1788_v28 = vmul.f32 %v1772_v20, %v3022_v35  ;;  %v1789_v62 = vmul.f32 %v1768_v36, %v3023_v21  ;;  %v1790_v5 = vmul.f32 %v1772_v20, %v3024_v27 }
 0x55d   :  { %v1791_v11 = vmul.f32 %v1768_v36, %v3025_v12  ;;  %v1792_v24 = vmul.f32 %v1772_v20, %v3026_v40  ;;  %v1793_v22 = vmul.f32 %v1776_v31, %v3027_v61  ;;  %v1794_v48 = vmul.f32 %v1780_v9, %v3028_v6  ;;  %1801 = vst [vmem:[#allocation9] sm:$0xff] %v1785_v58 }
 0x55e   :  { %1802 = vst [vmem:[#allocation9 + $0x8] sm:$0xff] %v1786_v44  ;;  %v1795_v57 = vmul.f32 %v1776_v31, %v3029_v7  ;;  %v1796_v34 = vmul.f32 %v1780_v9, %v3030_v60  ;;  %v1797_v33 = vmul.f32 %v1776_v31, %v3031_v0  ;;  %v1798_v45 = vmul.f32 %v1780_v9, %v3032_v37 }
 0x55f   :  { %1803 = vst [vmem:[#allocation9 + $0x10] sm:$0xff] %v1787_v15  ;;  %1804 = vst [vmem:[#allocation9 + $0x18] sm:$0xff] %v1788_v28  ;;  %v1799_v42 = vmul.f32 %v1776_v31, %v3033_v19  ;;  %v1800_v32 = vmul.f32 %v1780_v9, %v3034_v2 }
 0x560   :  { %1805 = vst [vmem:[#allocation9 + $0x20] sm:$0xff] %v1789_v62  ;;  %1806 = vst [vmem:[#allocation9 + $0x28] sm:$0xff] %v1790_v5 }
 0x561   :  { %1807 = vst [vmem:[#allocation9 + $0x30] sm:$0xff] %v1791_v11  ;;  %1808 = vst [vmem:[#allocation9 + $0x38] sm:$0xff] %v1792_v24 }
 0x562   :  { %1809 = vst [vmem:[#allocation9 + $0x40] sm:$0xff] %v1793_v22  ;;  %1810 = vst [vmem:[#allocation9 + $0x48] sm:$0xff] %v1794_v48 }
 0x563   :  { %1811 = vst [vmem:[#allocation9 + $0x50] sm:$0xff] %v1795_v57  ;;  %1812 = vst [vmem:[#allocation9 + $0x58] sm:$0xff] %v1796_v34 }
 0x564   :  { %1813 = vst [vmem:[#allocation9 + $0x60] sm:$0xff] %v1797_v33  ;;  %1814 = vst [vmem:[#allocation9 + $0x68] sm:$0xff] %v1798_v45 }
 0x565   :  { %1815 = vst [vmem:[#allocation9 + $0x70] sm:$0xff] %v1799_v42  ;;  %1816 = vst [vmem:[#allocation9 + $0x78] sm:$0xff] %v1800_v32 }
 0x566   :  { %2054 = shalt.err (!%p2051_p3)
}
 0x567   :  { %s2055_s9 = scalar_lea.hbm %s2980_s5, 2048 }
 0x568   :  { %p2056_p4 = scmp.ne.s32.totalorder %s2980_s5, %s2055_s9  ;;  %p2059_p5 = scmp.lt.u32.totalorder %s2055_s9, %s2980_s5 }
 0x56a   :  { %p2061_p6 = pnand %p2059_p5, %p2056_p4 }
 0x56c   :  { %2064 = shalt.err (!%p2061_p6)
}
 0x56d   :  { %1828 = dma.vmem_to_hbm [thread:$0]  %s1823_s27, 2048, %s2980_s5, [#allocation6], %s2072_s3, %s2072_s3, %s2073_s6  }
 0x56e   :  { %2069 = dma.done.wait [#allocation6], 2048  }
 0x56f   :  { %2070 = vsyncadd [#allocation6], 4294965248 }
 0x570   :  { %1832 = vsyncpa [#allocation5], 1 }
 0x571   :  { %1833 = vsyncpa [#allocation6], 1 }
 0x572   :  { %1834 = vsyncpa [#allocation7], 1 }

</bundles_post_ra>
